<compile_context>
chip_gen: v7x
topology: tpu7x:2x2x1
jax: 0.10.0
libtpu: 0.0.40
codegen_flags: <defaults>
</compile_context>

<pallas_src>
import numpy as np
import jax
import jax.numpy as jnp
from jax.experimental import pallas as pl
from jax.experimental.pallas import tpu as pltpu


# ----------------------------------------------------------------------------
# Host-side (init-time) helpers: faithful numpy ports of the torch utilities.
# The pinverse-based curve2coef runs once at parameter init, exactly like the
# PyTorch __init__ -- it is not part of the forward pass / kernel.
# ----------------------------------------------------------------------------

def extend_grid_np(grid, k_extend=0):
    h = (grid[:, -1:] - grid[:, :1]) / (grid.shape[1] - 1)
    for _ in range(k_extend):
        grid = np.concatenate([grid[:, :1] - h, grid], axis=1)
        grid = np.concatenate([grid, grid[:, -1:] + h], axis=1)
    return grid


def b_batch_np(x, grid, k=0):
    xe = x[:, :, None].astype(np.float32)
    ge = grid[None, :, :].astype(np.float32)
    if k == 0:
        value = ((xe >= ge[:, :, :-1]) & (xe < ge[:, :, 1:])).astype(np.float32)
    else:
        B_km1 = b_batch_np(x, grid, k - 1)
        value = ((xe - ge[:, :, :-(k + 1)])
                 / (ge[:, :, k:-1] - ge[:, :, :-(k + 1)]) * B_km1[:, :, :-1]
                 + (ge[:, :, k + 1:] - xe)
                 / (ge[:, :, k + 1:] - ge[:, :, 1:-k]) * B_km1[:, :, 1:])
    return np.nan_to_num(value)


def curve2coef_np(x_eval, y_eval, grid, k, lamb=1e-8):
    batch, in_dim = x_eval.shape
    out_dim = y_eval.shape[2]
    n_coef = grid.shape[1] - k - 1
    mat = b_batch_np(x_eval, grid, k)                            # (batch, in_dim, n_coef)
    mat = np.transpose(mat, (1, 0, 2))[:, None, :, :]
    mat = np.broadcast_to(mat, (in_dim, out_dim, batch, n_coef)).astype(np.float64)
    y = np.transpose(y_eval, (1, 2, 0))[:, :, :, None].astype(np.float64)
    XtX = np.einsum('ijmn,ijnp->ijmp', np.transpose(mat, (0, 1, 3, 2)), mat)
    Xty = np.einsum('ijmn,ijnp->ijmp', np.transpose(mat, (0, 1, 3, 2)), y)
    A = XtX + lamb * np.eye(n_coef)[None, None, :, :]
    coef = (np.linalg.pinv(A) @ Xty)[:, :, :, 0]
    return coef.astype(np.float32)                               # (in_dim, out_dim, num+k)


def init_spline_kan_params(in_dim, out_dim, num, k, key, noise_scale=0.5,
                           grid_range=(-1.0, 1.0)):
    """Deterministic re-implementation of SplineKANLayer.__init__."""
    grid = np.linspace(grid_range[0], grid_range[1], num + 1, dtype=np.float32)
    grid = np.broadcast_to(grid[None, :], (in_dim, num + 1)).copy()
    grid = extend_grid_np(grid, k_extend=k)                      # (in_dim, num+1+2k)
    noises = (np.asarray(jax.random.uniform(key, (num + 1, in_dim, out_dim),
                                            dtype=jnp.float32)) - 0.5) * noise_scale / num
    coef = curve2coef_np(grid[:, k:-k].T, noises, grid, k)       # (in_dim, out_dim, num+k)
    scale_sp = np.ones((in_dim, out_dim), dtype=np.float32)
    return grid, coef, scale_sp


# ----------------------------------------------------------------------------
# Constant packing (host-side, ONCE at factory time):
# knots + reciprocal Cox-de Boor denominators -> one tensor (in_dim, G-1, 2+4k)
#   cols 0,1:            g[j], g[j+1]                      (order-0 interval, only used if k==0)
#   cols 2+4(kk-1)+0..3: g[j], 1/(g[j+kk]-g[j]), g[j+kk+1], 1/(g[j+kk+1]-g[j+1])
# Rows beyond the valid basis count at each order are zero and never read.
# ----------------------------------------------------------------------------

def build_basis_constants(grid_np, k):
    in_dim, G = grid_np.shape
    g = grid_np.astype(np.float64)
    C = np.zeros((in_dim, G - 1, 2 + 4 * k), np.float64)
    C[:, :, 0] = g[:, :-1]
    C[:, :, 1] = g[:, 1:]
    for kk in range(1, k + 1):
        nb = G - 1 - kk
        col = 2 + 4 * (kk - 1)
        d1 = g[:, kk:kk + nb] - g[:, :nb]
        d2 = g[:, kk + 1:kk + 1 + nb] - g[:, 1:1 + nb]
        C[:, :nb, col + 0] = g[:, :nb]
        C[:, :nb, col + 1] = np.where(d1 != 0.0, 1.0 / np.where(d1 != 0.0, d1, 1.0), 0.0)
        C[:, :nb, col + 2] = g[:, kk + 1:kk + 1 + nb]
        C[:, :nb, col + 3] = np.where(d2 != 0.0, 1.0 / np.where(d2 != 0.0, d2, 1.0), 0.0)
    return C.astype(np.float32)


# ----------------------------------------------------------------------------
# Pallas kernel: fused B-spline basis (batch on lanes) + MXU contraction.
# ----------------------------------------------------------------------------

def make_spline_kan_kernel(in_dim, out_dim, G, k):
    def kernel(x_ref, c_ref, w_ref, o_ref):
        # x_ref: (in_dim, tb)               f32  -- batch on the 128-lane axis
        # c_ref: (in_dim, G-1, 2+4k)        f32  -- knots + reciprocal denominators
        # w_ref: (in_dim, out_dim, n_basis) f32  -- coef * scale_sp
        # o_ref: (out_dim, tb)              f32  -- lane-dense output block
        tb = x_ref.shape[1]
        acc = jnp.zeros(o_ref.shape, jnp.float32)
        for i in range(in_dim):                                  # in_dim is tiny (3): unrolled
            if k == 0:
                xi = x_ref[i:i + 1, :]
                g_lo = c_ref[i, :, 0:1]
                g_hi = c_ref[i, :, 1:2]
                B = jnp.where((xi >= g_lo) & (xi < g_hi), 1.0, 0.0)
            else:
                # Hoisted sublane broadcast of x_i: materialized ONCE per channel
                # (JAX does not CSE broadcast_in_dim), prefix-sliced per order.
                nb1 = G - 2
                xi_b = jnp.broadcast_to(x_ref[i:i + 1, :], (nb1, tb))
                # Fused order-0 + order-1: closed-form hat function. Exact for
                # the distinct knots of the uniform extended grid; zero-padded
                # reciprocals reproduce torch.nan_to_num for repeated knots and
                # the half-open right-boundary convention of torch's order-0.
                gj = c_ref[i, 0:nb1, 2:3]
                r1 = c_ref[i, 0:nb1, 3:4]
                gj2 = c_ref[i, 0:nb1, 4:5]
                r2 = c_ref[i, 0:nb1, 5:6]
                B = jnp.maximum(0.0, jnp.minimum((xi_b - gj) * r1,
                                                 (gj2 - xi_b) * r2))         # (G-2, tb)
                # Remaining Cox-de Boor orders: reciprocal denominators are
                # precomputed constants -> pure VPU mul/add, no divides.
                for kk in range(2, k + 1):
                    nb = G - 1 - kk
                    col = 2 + 4 * (kk - 1)
                    gj = c_ref[i, 0:nb, col + 0:col + 1]                     # (nb, 1)
                    r1 = c_ref[i, 0:nb, col + 1:col + 2]                     # 1/(g[j+kk]-g[j])
                    gjk1 = c_ref[i, 0:nb, col + 2:col + 3]
                    r2 = c_ref[i, 0:nb, col + 3:col + 4]                     # 1/(g[j+kk+1]-g[j+1])
                    xi = xi_b[0:nb, :]                                       # prefix slice of hoisted bcast
                    # TODO(synk): B[1:nb+1] is a +1-sublane shift; swap for
                    # pltpu.roll once the bundle dump confirms XLU lowering.
                    B = ((xi - gj) * r1 * B[0:nb, :]
                         + (gjk1 - xi) * r2 * B[1:nb + 1, :])                # (nb, tb)
            # Per-channel contraction on the MXU, f32 accumulation.
            acc = acc + jnp.dot(w_ref[i], B, preferred_element_type=jnp.float32)
        o_ref[...] = acc

    return kernel


# ----------------------------------------------------------------------------
# Generation-aware batch-tile selection.
# ----------------------------------------------------------------------------

def _tensorcores_per_chip():
    """Best-effort TensorCores-per-chip detection (v7x / v5p / v4 have 2)."""
    try:
        kind = jax.devices()[0].device_kind.lower()
    except Exception:
        return 1
    return 2 if ("v7" in kind or "v5p" in kind or "v4" in kind) else 1


def _pick_batch_tile(batch, n_cores, cap=8192, lanes=128):
    """Large tiles amortize the ~0.35us per-grid-step overhead (kernel is
    VALU-bound with negligible VMEM footprint, so the cap can be big).
    Single-TC chips (v5e/v6e): one tile per call when the batch fits the cap.
    Dual-TC chips (v7x/v5p/v4): >=2 grid steps with an EVEN step count so both
    TensorCores get balanced work on the 'parallel' batch axis."""
    pb = int(pl.cdiv(batch, lanes)) * lanes
    if n_cores <= 1 or pb <= lanes:
        return int(min(pb, cap))
    steps = int(pl.cdiv(pb, cap))
    steps = max(2, 2 * int(pl.cdiv(steps, 2)))          # even, >= 2
    tile = int(pl.cdiv(int(pl.cdiv(pb, steps)), lanes)) * lanes
    return int(max(lanes, min(tile, cap)))


# ----------------------------------------------------------------------------
# Forward factory: builds device-resident constants ONCE and returns a jitted
# forward(x: (batch, in_dim)) -> (batch, out_dim).
# ----------------------------------------------------------------------------

def make_spline_kan_forward(grid_np, coef_np, scale_sp_np, k, tb=None, tile_cap=8192):
    in_dim, G = grid_np.shape
    out_dim = coef_np.shape[1]
    n_basis = coef_np.shape[2]
    assert n_basis == G - 1 - k

    # Hoisted out of the per-call path: knot/reciprocal table and fused weight.
    C = jnp.asarray(build_basis_constants(grid_np, k))                 # (in_dim, G-1, 2+4k)
    W = jnp.asarray(coef_np * scale_sp_np[:, :, None], jnp.float32)    # (in_dim, out_dim, n_basis)
    ncols = int(C.shape[2])

    kernel = make_spline_kan_kernel(in_dim, out_dim, G, k)
    n_cores = _tensorcores_per_chip()

    @jax.jit
    def forward(x):
        batch = x.shape[0]
        tile = int(tb) if tb is not None else _pick_batch_tile(batch, n_cores, cap=tile_cap)
        pb = int(pl.cdiv(batch, tile)) * tile

        # Batch-on-lanes layout; zero-pad the batch remainder (sliced off below).
        # Transposes/pad live in the same jit as the pallas_call so XLA fuses
        # the layout plumbing with the launch.
        x_t = jnp.transpose(x.astype(jnp.float32))                     # (in_dim, batch)
        if pb != batch:
            x_t = jnp.pad(x_t, ((0, 0), (0, pb - batch)))

        y_t = pl.pallas_call(
            kernel,
            out_shape=jax.ShapeDtypeStruct((out_dim, pb), jnp.float32),
            grid_spec=pltpu.PrefetchScalarGridSpec(
                num_scalar_prefetch=0,
                grid=(pb // tile,),
                in_specs=[
                    pl.BlockSpec((in_dim, tile), lambda b: (0, b)),
                    pl.BlockSpec((in_dim, G - 1, ncols), lambda b: (0, 0, 0)),
                    pl.BlockSpec((in_dim, out_dim, n_basis), lambda b: (0, 0, 0)),
                ],
                out_specs=pl.BlockSpec((out_dim, tile), lambda b: (0, b)),
            ),
            compiler_params=pltpu.CompilerParams(
                dimension_semantics=("parallel",)),
        )(x_t, C, W)

        # Back to the module's (batch, out_dim) layout; drop batch padding.
        return jnp.transpose(y_t)[:batch]

    return forward


# ----------------------------------------------------------------------------
# Pure-numpy reference of SplineKANLayer.forward (for correctness check).
# ----------------------------------------------------------------------------

def reference_forward(x, grid, coef, scale_sp, k):
    basis = b_batch_np(x, grid, k)                               # (batch, in_dim, n_basis)
    y_eval = np.einsum('ijk,jlk->ijl', basis, coef)              # (batch, in_dim, out_dim)
    y = (scale_sp[None, :, :] * y_eval).sum(axis=1)              # (batch, out_dim)
    return y.astype(np.float32)


if __name__ == "__main__":
    in_dim, out_dim, num, degree = 3, 2, 5, 5                    # SplineKANLayer defaults
    batch = 256

    key = jax.random.PRNGKey(0)
    k_noise, k_x = jax.random.split(key)

    grid_np, coef_np, scale_sp_np = init_spline_kan_params(
        in_dim, out_dim, num, degree, k_noise)

    forward = make_spline_kan_forward(grid_np, coef_np, scale_sp_np, degree)

    x = jax.random.uniform(k_x, (batch, in_dim), dtype=jnp.float32,
                           minval=-1.0, maxval=1.0)

    y = jax.block_until_ready(forward(x))

    y_ref = reference_forward(np.asarray(x), grid_np, coef_np, scale_sp_np, degree)
    assert y.shape == (batch, out_dim)
    max_err = float(np.max(np.abs(np.asarray(y) - y_ref)))
    assert np.allclose(np.asarray(y), y_ref, atol=1e-4, rtol=1e-3), max_err

    print("KERNEL_OK")
</pallas_src>

<mosaic_0001>
module attributes {stable_mosaic.version = 11 : i64} {
  func.func @kernel(%arg0: i32, %arg1: memref<3x256xf32, #tpu.memory_space<vmem>>, %arg2: memref<3x15x22xf32, #tpu.memory_space<vmem>>, %arg3: memref<3x2x10xf32, #tpu.memory_space<vmem>>, %arg4: memref<2x256xf32, #tpu.memory_space<vmem>>) attributes {dimension_semantics = [#tpu.dimension_semantics<parallel>], iteration_bounds = array<i64: 1>, scalar_prefetch = 0 : i64, scratch_operands = 0 : i64, tpu.core_type = #tpu.core_type<tc>, window_params = [{transform_indices = @transform_0, window_bounds = array<i64: 3, 256>}, {pipeline_mode = #tpu.pipeline_mode<synchronous>, transform_indices = @transform_1, window_bounds = array<i64: 3, 15, 22>}, {pipeline_mode = #tpu.pipeline_mode<synchronous>, transform_indices = @transform_2, window_bounds = array<i64: 3, 2, 10>}, {transform_indices = @transform_3, window_bounds = array<i64: 2, 256>}]} {
    %cst = arith.constant 0.000000e+00 : f32
    %0 = vector.broadcast %cst : f32 to vector<2x256xf32>
    %c0 = arith.constant 0 : index
    %c0_0 = arith.constant 0 : index
    %1 = vector.load %arg1[%c0, %c0_0] : memref<3x256xf32, #tpu.memory_space<vmem>>, vector<1x256xf32>
    %2 = vector.shape_cast %1 : vector<1x256xf32> to vector<1x256xf32>
    %3 = vector.broadcast %2 : vector<1x256xf32> to vector<14x256xf32>
    %c0_1 = arith.constant 0 : index
    %c0_2 = arith.constant 0 : index
    %c2 = arith.constant 2 : index
    %4 = vector.load %arg2[%c0_1, %c0_2, %c2] : memref<3x15x22xf32, #tpu.memory_space<vmem>>, vector<1x14x1xf32>
    %5 = vector.shape_cast %4 : vector<1x14x1xf32> to vector<14x1xf32>
    %c0_3 = arith.constant 0 : index
    %c0_4 = arith.constant 0 : index
    %c3 = arith.constant 3 : index
    %6 = vector.load %arg2[%c0_3, %c0_4, %c3] : memref<3x15x22xf32, #tpu.memory_space<vmem>>, vector<1x14x1xf32>
    %7 = vector.shape_cast %6 : vector<1x14x1xf32> to vector<14x1xf32>
    %c0_5 = arith.constant 0 : index
    %c0_6 = arith.constant 0 : index
    %c4 = arith.constant 4 : index
    %8 = vector.load %arg2[%c0_5, %c0_6, %c4] : memref<3x15x22xf32, #tpu.memory_space<vmem>>, vector<1x14x1xf32>
    %9 = vector.shape_cast %8 : vector<1x14x1xf32> to vector<14x1xf32>
    %c0_7 = arith.constant 0 : index
    %c0_8 = arith.constant 0 : index
    %c5 = arith.constant 5 : index
    %10 = vector.load %arg2[%c0_7, %c0_8, %c5] : memref<3x15x22xf32, #tpu.memory_space<vmem>>, vector<1x14x1xf32>
    %11 = vector.shape_cast %10 : vector<1x14x1xf32> to vector<14x1xf32>
    %12 = vector.broadcast %5 : vector<14x1xf32> to vector<14x256xf32>
    %13 = arith.subf %3, %12 : vector<14x256xf32>
    %14 = vector.broadcast %7 : vector<14x1xf32> to vector<14x256xf32>
    %15 = arith.mulf %13, %14 : vector<14x256xf32>
    %16 = vector.broadcast %9 : vector<14x1xf32> to vector<14x256xf32>
    %17 = arith.subf %16, %3 : vector<14x256xf32>
    %18 = vector.broadcast %11 : vector<14x1xf32> to vector<14x256xf32>
    %19 = arith.mulf %17, %18 : vector<14x256xf32>
    %20 = arith.minimumf %15, %19 : vector<14x256xf32>
    %cst_9 = arith.constant 0.000000e+00 : f32
    %21 = vector.broadcast %cst_9 : f32 to vector<14x256xf32>
    %22 = arith.maximumf %21, %20 : vector<14x256xf32>
    %c0_10 = arith.constant 0 : index
    %c0_11 = arith.constant 0 : index
    %c6 = arith.constant 6 : index
    %23 = vector.load %arg2[%c0_10, %c0_11, %c6] : memref<3x15x22xf32, #tpu.memory_space<vmem>>, vector<1x13x1xf32>
    %24 = vector.shape_cast %23 : vector<1x13x1xf32> to vector<13x1xf32>
    %c0_12 = arith.constant 0 : index
    %c0_13 = arith.constant 0 : index
    %c7 = arith.constant 7 : index
    %25 = vector.load %arg2[%c0_12, %c0_13, %c7] : memref<3x15x22xf32, #tpu.memory_space<vmem>>, vector<1x13x1xf32>
    %26 = vector.shape_cast %25 : vector<1x13x1xf32> to vector<13x1xf32>
    %c0_14 = arith.constant 0 : index
    %c0_15 = arith.constant 0 : index
    %c8 = arith.constant 8 : index
    %27 = vector.load %arg2[%c0_14, %c0_15, %c8] : memref<3x15x22xf32, #tpu.memory_space<vmem>>, vector<1x13x1xf32>
    %28 = vector.shape_cast %27 : vector<1x13x1xf32> to vector<13x1xf32>
    %c0_16 = arith.constant 0 : index
    %c0_17 = arith.constant 0 : index
    %c9 = arith.constant 9 : index
    %29 = vector.load %arg2[%c0_16, %c0_17, %c9] : memref<3x15x22xf32, #tpu.memory_space<vmem>>, vector<1x13x1xf32>
    %30 = vector.shape_cast %29 : vector<1x13x1xf32> to vector<13x1xf32>
    %31 = vector.extract_strided_slice %3 {offsets = [0, 0], sizes = [13, 256], strides = [1, 1]} : vector<14x256xf32> to vector<13x256xf32>
    %32 = vector.broadcast %24 : vector<13x1xf32> to vector<13x256xf32>
    %33 = arith.subf %31, %32 : vector<13x256xf32>
    %34 = vector.broadcast %26 : vector<13x1xf32> to vector<13x256xf32>
    %35 = arith.mulf %33, %34 : vector<13x256xf32>
    %36 = vector.extract_strided_slice %22 {offsets = [0, 0], sizes = [13, 256], strides = [1, 1]} : vector<14x256xf32> to vector<13x256xf32>
    %37 = arith.mulf %35, %36 : vector<13x256xf32>
    %38 = vector.broadcast %28 : vector<13x1xf32> to vector<13x256xf32>
    %39 = arith.subf %38, %31 : vector<13x256xf32>
    %40 = vector.broadcast %30 : vector<13x1xf32> to vector<13x256xf32>
    %41 = arith.mulf %39, %40 : vector<13x256xf32>
    %42 = vector.extract_strided_slice %22 {offsets = [1, 0], sizes = [13, 256], strides = [1, 1]} : vector<14x256xf32> to vector<13x256xf32>
    %43 = arith.mulf %41, %42 : vector<13x256xf32>
    %44 = arith.addf %37, %43 : vector<13x256xf32>
    %c0_18 = arith.constant 0 : index
    %c0_19 = arith.constant 0 : index
    %c10 = arith.constant 10 : index
    %45 = vector.load %arg2[%c0_18, %c0_19, %c10] : memref<3x15x22xf32, #tpu.memory_space<vmem>>, vector<1x12x1xf32>
    %46 = vector.shape_cast %45 : vector<1x12x1xf32> to vector<12x1xf32>
    %c0_20 = arith.constant 0 : index
    %c0_21 = arith.constant 0 : index
    %c11 = arith.constant 11 : index
    %47 = vector.load %arg2[%c0_20, %c0_21, %c11] : memref<3x15x22xf32, #tpu.memory_space<vmem>>, vector<1x12x1xf32>
    %48 = vector.shape_cast %47 : vector<1x12x1xf32> to vector<12x1xf32>
    %c0_22 = arith.constant 0 : index
    %c0_23 = arith.constant 0 : index
    %c12 = arith.constant 12 : index
    %49 = vector.load %arg2[%c0_22, %c0_23, %c12] : memref<3x15x22xf32, #tpu.memory_space<vmem>>, vector<1x12x1xf32>
    %50 = vector.shape_cast %49 : vector<1x12x1xf32> to vector<12x1xf32>
    %c0_24 = arith.constant 0 : index
    %c0_25 = arith.constant 0 : index
    %c13 = arith.constant 13 : index
    %51 = vector.load %arg2[%c0_24, %c0_25, %c13] : memref<3x15x22xf32, #tpu.memory_space<vmem>>, vector<1x12x1xf32>
    %52 = vector.shape_cast %51 : vector<1x12x1xf32> to vector<12x1xf32>
    %53 = vector.extract_strided_slice %3 {offsets = [0, 0], sizes = [12, 256], strides = [1, 1]} : vector<14x256xf32> to vector<12x256xf32>
    %54 = vector.broadcast %46 : vector<12x1xf32> to vector<12x256xf32>
    %55 = arith.subf %53, %54 : vector<12x256xf32>
    %56 = vector.broadcast %48 : vector<12x1xf32> to vector<12x256xf32>
    %57 = arith.mulf %55, %56 : vector<12x256xf32>
    %58 = vector.extract_strided_slice %44 {offsets = [0, 0], sizes = [12, 256], strides = [1, 1]} : vector<13x256xf32> to vector<12x256xf32>
    %59 = arith.mulf %57, %58 : vector<12x256xf32>
    %60 = vector.broadcast %50 : vector<12x1xf32> to vector<12x256xf32>
    %61 = arith.subf %60, %53 : vector<12x256xf32>
    %62 = vector.broadcast %52 : vector<12x1xf32> to vector<12x256xf32>
    %63 = arith.mulf %61, %62 : vector<12x256xf32>
    %64 = vector.extract_strided_slice %44 {offsets = [1, 0], sizes = [12, 256], strides = [1, 1]} : vector<13x256xf32> to vector<12x256xf32>
    %65 = arith.mulf %63, %64 : vector<12x256xf32>
    %66 = arith.addf %59, %65 : vector<12x256xf32>
    %c0_26 = arith.constant 0 : index
    %c0_27 = arith.constant 0 : index
    %c14 = arith.constant 14 : index
    %67 = vector.load %arg2[%c0_26, %c0_27, %c14] : memref<3x15x22xf32, #tpu.memory_space<vmem>>, vector<1x11x1xf32>
    %68 = vector.shape_cast %67 : vector<1x11x1xf32> to vector<11x1xf32>
    %c0_28 = arith.constant 0 : index
    %c0_29 = arith.constant 0 : index
    %c15 = arith.constant 15 : index
    %69 = vector.load %arg2[%c0_28, %c0_29, %c15] : memref<3x15x22xf32, #tpu.memory_space<vmem>>, vector<1x11x1xf32>
    %70 = vector.shape_cast %69 : vector<1x11x1xf32> to vector<11x1xf32>
    %c0_30 = arith.constant 0 : index
    %c0_31 = arith.constant 0 : index
    %c16 = arith.constant 16 : index
    %71 = vector.load %arg2[%c0_30, %c0_31, %c16] : memref<3x15x22xf32, #tpu.memory_space<vmem>>, vector<1x11x1xf32>
    %72 = vector.shape_cast %71 : vector<1x11x1xf32> to vector<11x1xf32>
    %c0_32 = arith.constant 0 : index
    %c0_33 = arith.constant 0 : index
    %c17 = arith.constant 17 : index
    %73 = vector.load %arg2[%c0_32, %c0_33, %c17] : memref<3x15x22xf32, #tpu.memory_space<vmem>>, vector<1x11x1xf32>
    %74 = vector.shape_cast %73 : vector<1x11x1xf32> to vector<11x1xf32>
    %75 = vector.extract_strided_slice %3 {offsets = [0, 0], sizes = [11, 256], strides = [1, 1]} : vector<14x256xf32> to vector<11x256xf32>
    %76 = vector.broadcast %68 : vector<11x1xf32> to vector<11x256xf32>
    %77 = arith.subf %75, %76 : vector<11x256xf32>
    %78 = vector.broadcast %70 : vector<11x1xf32> to vector<11x256xf32>
    %79 = arith.mulf %77, %78 : vector<11x256xf32>
    %80 = vector.extract_strided_slice %66 {offsets = [0, 0], sizes = [11, 256], strides = [1, 1]} : vector<12x256xf32> to vector<11x256xf32>
    %81 = arith.mulf %79, %80 : vector<11x256xf32>
    %82 = vector.broadcast %72 : vector<11x1xf32> to vector<11x256xf32>
    %83 = arith.subf %82, %75 : vector<11x256xf32>
    %84 = vector.broadcast %74 : vector<11x1xf32> to vector<11x256xf32>
    %85 = arith.mulf %83, %84 : vector<11x256xf32>
    %86 = vector.extract_strided_slice %66 {offsets = [1, 0], sizes = [11, 256], strides = [1, 1]} : vector<12x256xf32> to vector<11x256xf32>
    %87 = arith.mulf %85, %86 : vector<11x256xf32>
    %88 = arith.addf %81, %87 : vector<11x256xf32>
    %c0_34 = arith.constant 0 : index
    %c0_35 = arith.constant 0 : index
    %c18 = arith.constant 18 : index
    %89 = vector.load %arg2[%c0_34, %c0_35, %c18] : memref<3x15x22xf32, #tpu.memory_space<vmem>>, vector<1x10x1xf32>
    %90 = vector.shape_cast %89 : vector<1x10x1xf32> to vector<10x1xf32>
    %c0_36 = arith.constant 0 : index
    %c0_37 = arith.constant 0 : index
    %c19 = arith.constant 19 : index
    %91 = vector.load %arg2[%c0_36, %c0_37, %c19] : memref<3x15x22xf32, #tpu.memory_space<vmem>>, vector<1x10x1xf32>
    %92 = vector.shape_cast %91 : vector<1x10x1xf32> to vector<10x1xf32>
    %c0_38 = arith.constant 0 : index
    %c0_39 = arith.constant 0 : index
    %c20 = arith.constant 20 : index
    %93 = vector.load %arg2[%c0_38, %c0_39, %c20] : memref<3x15x22xf32, #tpu.memory_space<vmem>>, vector<1x10x1xf32>
    %94 = vector.shape_cast %93 : vector<1x10x1xf32> to vector<10x1xf32>
    %c0_40 = arith.constant 0 : index
    %c0_41 = arith.constant 0 : index
    %c21 = arith.constant 21 : index
    %95 = vector.load %arg2[%c0_40, %c0_41, %c21] : memref<3x15x22xf32, #tpu.memory_space<vmem>>, vector<1x10x1xf32>
    %96 = vector.shape_cast %95 : vector<1x10x1xf32> to vector<10x1xf32>
    %97 = vector.extract_strided_slice %3 {offsets = [0, 0], sizes = [10, 256], strides = [1, 1]} : vector<14x256xf32> to vector<10x256xf32>
    %98 = vector.broadcast %90 : vector<10x1xf32> to vector<10x256xf32>
    %99 = arith.subf %97, %98 : vector<10x256xf32>
    %100 = vector.broadcast %92 : vector<10x1xf32> to vector<10x256xf32>
    %101 = arith.mulf %99, %100 : vector<10x256xf32>
    %102 = vector.extract_strided_slice %88 {offsets = [0, 0], sizes = [10, 256], strides = [1, 1]} : vector<11x256xf32> to vector<10x256xf32>
    %103 = arith.mulf %101, %102 : vector<10x256xf32>
    %104 = vector.broadcast %94 : vector<10x1xf32> to vector<10x256xf32>
    %105 = arith.subf %104, %97 : vector<10x256xf32>
    %106 = vector.broadcast %96 : vector<10x1xf32> to vector<10x256xf32>
    %107 = arith.mulf %105, %106 : vector<10x256xf32>
    %108 = vector.extract_strided_slice %88 {offsets = [1, 0], sizes = [10, 256], strides = [1, 1]} : vector<11x256xf32> to vector<10x256xf32>
    %109 = arith.mulf %107, %108 : vector<10x256xf32>
    %110 = arith.addf %103, %109 : vector<10x256xf32>
    %c0_42 = arith.constant 0 : index
    %c0_43 = arith.constant 0 : index
    %c0_44 = arith.constant 0 : index
    %111 = vector.load %arg3[%c0_42, %c0_43, %c0_44] : memref<3x2x10xf32, #tpu.memory_space<vmem>>, vector<1x2x10xf32>
    %112 = vector.shape_cast %111 : vector<1x2x10xf32> to vector<2x10xf32>
    %cst_45 = arith.constant dense<0.000000e+00> : vector<2x256xf32>
    %113 = tpu.matmul %112, %110, %cst_45 {dimension_numbers = #tpu.dot_dimension_numbers<[1], [0], [0], [1], [0, 0, 1, 1], [], []>} : vector<2x10xf32>, vector<10x256xf32>, vector<2x256xf32> -> vector<2x256xf32>
    %114 = arith.addf %0, %113 : vector<2x256xf32>
    %c1 = arith.constant 1 : index
    %c0_46 = arith.constant 0 : index
    %115 = vector.load %arg1[%c1, %c0_46] : memref<3x256xf32, #tpu.memory_space<vmem>>, vector<1x256xf32>
    %116 = vector.shape_cast %115 : vector<1x256xf32> to vector<1x256xf32>
    %117 = vector.broadcast %116 : vector<1x256xf32> to vector<14x256xf32>
    %c1_47 = arith.constant 1 : index
    %c0_48 = arith.constant 0 : index
    %c2_49 = arith.constant 2 : index
    %118 = vector.load %arg2[%c1_47, %c0_48, %c2_49] : memref<3x15x22xf32, #tpu.memory_space<vmem>>, vector<1x14x1xf32>
    %119 = vector.shape_cast %118 : vector<1x14x1xf32> to vector<14x1xf32>
    %c1_50 = arith.constant 1 : index
    %c0_51 = arith.constant 0 : index
    %c3_52 = arith.constant 3 : index
    %120 = vector.load %arg2[%c1_50, %c0_51, %c3_52] : memref<3x15x22xf32, #tpu.memory_space<vmem>>, vector<1x14x1xf32>
    %121 = vector.shape_cast %120 : vector<1x14x1xf32> to vector<14x1xf32>
    %c1_53 = arith.constant 1 : index
    %c0_54 = arith.constant 0 : index
    %c4_55 = arith.constant 4 : index
    %122 = vector.load %arg2[%c1_53, %c0_54, %c4_55] : memref<3x15x22xf32, #tpu.memory_space<vmem>>, vector<1x14x1xf32>
    %123 = vector.shape_cast %122 : vector<1x14x1xf32> to vector<14x1xf32>
    %c1_56 = arith.constant 1 : index
    %c0_57 = arith.constant 0 : index
    %c5_58 = arith.constant 5 : index
    %124 = vector.load %arg2[%c1_56, %c0_57, %c5_58] : memref<3x15x22xf32, #tpu.memory_space<vmem>>, vector<1x14x1xf32>
    %125 = vector.shape_cast %124 : vector<1x14x1xf32> to vector<14x1xf32>
    %126 = vector.broadcast %119 : vector<14x1xf32> to vector<14x256xf32>
    %127 = arith.subf %117, %126 : vector<14x256xf32>
    %128 = vector.broadcast %121 : vector<14x1xf32> to vector<14x256xf32>
    %129 = arith.mulf %127, %128 : vector<14x256xf32>
    %130 = vector.broadcast %123 : vector<14x1xf32> to vector<14x256xf32>
    %131 = arith.subf %130, %117 : vector<14x256xf32>
    %132 = vector.broadcast %125 : vector<14x1xf32> to vector<14x256xf32>
    %133 = arith.mulf %131, %132 : vector<14x256xf32>
    %134 = arith.minimumf %129, %133 : vector<14x256xf32>
    %cst_59 = arith.constant 0.000000e+00 : f32
    %135 = vector.broadcast %cst_59 : f32 to vector<14x256xf32>
    %136 = arith.maximumf %135, %134 : vector<14x256xf32>
    %c1_60 = arith.constant 1 : index
    %c0_61 = arith.constant 0 : index
    %c6_62 = arith.constant 6 : index
    %137 = vector.load %arg2[%c1_60, %c0_61, %c6_62] : memref<3x15x22xf32, #tpu.memory_space<vmem>>, vector<1x13x1xf32>
    %138 = vector.shape_cast %137 : vector<1x13x1xf32> to vector<13x1xf32>
    %c1_63 = arith.constant 1 : index
    %c0_64 = arith.constant 0 : index
    %c7_65 = arith.constant 7 : index
    %139 = vector.load %arg2[%c1_63, %c0_64, %c7_65] : memref<3x15x22xf32, #tpu.memory_space<vmem>>, vector<1x13x1xf32>
    %140 = vector.shape_cast %139 : vector<1x13x1xf32> to vector<13x1xf32>
    %c1_66 = arith.constant 1 : index
    %c0_67 = arith.constant 0 : index
    %c8_68 = arith.constant 8 : index
    %141 = vector.load %arg2[%c1_66, %c0_67, %c8_68] : memref<3x15x22xf32, #tpu.memory_space<vmem>>, vector<1x13x1xf32>
    %142 = vector.shape_cast %141 : vector<1x13x1xf32> to vector<13x1xf32>
    %c1_69 = arith.constant 1 : index
    %c0_70 = arith.constant 0 : index
    %c9_71 = arith.constant 9 : index
    %143 = vector.load %arg2[%c1_69, %c0_70, %c9_71] : memref<3x15x22xf32, #tpu.memory_space<vmem>>, vector<1x13x1xf32>
    %144 = vector.shape_cast %143 : vector<1x13x1xf32> to vector<13x1xf32>
    %145 = vector.extract_strided_slice %117 {offsets = [0, 0], sizes = [13, 256], strides = [1, 1]} : vector<14x256xf32> to vector<13x256xf32>
    %146 = vector.broadcast %138 : vector<13x1xf32> to vector<13x256xf32>
    %147 = arith.subf %145, %146 : vector<13x256xf32>
    %148 = vector.broadcast %140 : vector<13x1xf32> to vector<13x256xf32>
    %149 = arith.mulf %147, %148 : vector<13x256xf32>
    %150 = vector.extract_strided_slice %136 {offsets = [0, 0], sizes = [13, 256], strides = [1, 1]} : vector<14x256xf32> to vector<13x256xf32>
    %151 = arith.mulf %149, %150 : vector<13x256xf32>
    %152 = vector.broadcast %142 : vector<13x1xf32> to vector<13x256xf32>
    %153 = arith.subf %152, %145 : vector<13x256xf32>
    %154 = vector.broadcast %144 : vector<13x1xf32> to vector<13x256xf32>
    %155 = arith.mulf %153, %154 : vector<13x256xf32>
    %156 = vector.extract_strided_slice %136 {offsets = [1, 0], sizes = [13, 256], strides = [1, 1]} : vector<14x256xf32> to vector<13x256xf32>
    %157 = arith.mulf %155, %156 : vector<13x256xf32>
    %158 = arith.addf %151, %157 : vector<13x256xf32>
    %c1_72 = arith.constant 1 : index
    %c0_73 = arith.constant 0 : index
    %c10_74 = arith.constant 10 : index
    %159 = vector.load %arg2[%c1_72, %c0_73, %c10_74] : memref<3x15x22xf32, #tpu.memory_space<vmem>>, vector<1x12x1xf32>
    %160 = vector.shape_cast %159 : vector<1x12x1xf32> to vector<12x1xf32>
    %c1_75 = arith.constant 1 : index
    %c0_76 = arith.constant 0 : index
    %c11_77 = arith.constant 11 : index
    %161 = vector.load %arg2[%c1_75, %c0_76, %c11_77] : memref<3x15x22xf32, #tpu.memory_space<vmem>>, vector<1x12x1xf32>
    %162 = vector.shape_cast %161 : vector<1x12x1xf32> to vector<12x1xf32>
    %c1_78 = arith.constant 1 : index
    %c0_79 = arith.constant 0 : index
    %c12_80 = arith.constant 12 : index
    %163 = vector.load %arg2[%c1_78, %c0_79, %c12_80] : memref<3x15x22xf32, #tpu.memory_space<vmem>>, vector<1x12x1xf32>
    %164 = vector.shape_cast %163 : vector<1x12x1xf32> to vector<12x1xf32>
    %c1_81 = arith.constant 1 : index
    %c0_82 = arith.constant 0 : index
    %c13_83 = arith.constant 13 : index
    %165 = vector.load %arg2[%c1_81, %c0_82, %c13_83] : memref<3x15x22xf32, #tpu.memory_space<vmem>>, vector<1x12x1xf32>
    %166 = vector.shape_cast %165 : vector<1x12x1xf32> to vector<12x1xf32>
    %167 = vector.extract_strided_slice %117 {offsets = [0, 0], sizes = [12, 256], strides = [1, 1]} : vector<14x256xf32> to vector<12x256xf32>
    %168 = vector.broadcast %160 : vector<12x1xf32> to vector<12x256xf32>
    %169 = arith.subf %167, %168 : vector<12x256xf32>
    %170 = vector.broadcast %162 : vector<12x1xf32> to vector<12x256xf32>
    %171 = arith.mulf %169, %170 : vector<12x256xf32>
    %172 = vector.extract_strided_slice %158 {offsets = [0, 0], sizes = [12, 256], strides = [1, 1]} : vector<13x256xf32> to vector<12x256xf32>
    %173 = arith.mulf %171, %172 : vector<12x256xf32>
    %174 = vector.broadcast %164 : vector<12x1xf32> to vector<12x256xf32>
    %175 = arith.subf %174, %167 : vector<12x256xf32>
    %176 = vector.broadcast %166 : vector<12x1xf32> to vector<12x256xf32>
    %177 = arith.mulf %175, %176 : vector<12x256xf32>
    %178 = vector.extract_strided_slice %158 {offsets = [1, 0], sizes = [12, 256], strides = [1, 1]} : vector<13x256xf32> to vector<12x256xf32>
    %179 = arith.mulf %177, %178 : vector<12x256xf32>
    %180 = arith.addf %173, %179 : vector<12x256xf32>
    %c1_84 = arith.constant 1 : index
    %c0_85 = arith.constant 0 : index
    %c14_86 = arith.constant 14 : index
    %181 = vector.load %arg2[%c1_84, %c0_85, %c14_86] : memref<3x15x22xf32, #tpu.memory_space<vmem>>, vector<1x11x1xf32>
    %182 = vector.shape_cast %181 : vector<1x11x1xf32> to vector<11x1xf32>
    %c1_87 = arith.constant 1 : index
    %c0_88 = arith.constant 0 : index
    %c15_89 = arith.constant 15 : index
    %183 = vector.load %arg2[%c1_87, %c0_88, %c15_89] : memref<3x15x22xf32, #tpu.memory_space<vmem>>, vector<1x11x1xf32>
    %184 = vector.shape_cast %183 : vector<1x11x1xf32> to vector<11x1xf32>
    %c1_90 = arith.constant 1 : index
    %c0_91 = arith.constant 0 : index
    %c16_92 = arith.constant 16 : index
    %185 = vector.load %arg2[%c1_90, %c0_91, %c16_92] : memref<3x15x22xf32, #tpu.memory_space<vmem>>, vector<1x11x1xf32>
    %186 = vector.shape_cast %185 : vector<1x11x1xf32> to vector<11x1xf32>
    %c1_93 = arith.constant 1 : index
    %c0_94 = arith.constant 0 : index
    %c17_95 = arith.constant 17 : index
    %187 = vector.load %arg2[%c1_93, %c0_94, %c17_95] : memref<3x15x22xf32, #tpu.memory_space<vmem>>, vector<1x11x1xf32>
    %188 = vector.shape_cast %187 : vector<1x11x1xf32> to vector<11x1xf32>
    %189 = vector.extract_strided_slice %117 {offsets = [0, 0], sizes = [11, 256], strides = [1, 1]} : vector<14x256xf32> to vector<11x256xf32>
    %190 = vector.broadcast %182 : vector<11x1xf32> to vector<11x256xf32>
    %191 = arith.subf %189, %190 : vector<11x256xf32>
    %192 = vector.broadcast %184 : vector<11x1xf32> to vector<11x256xf32>
    %193 = arith.mulf %191, %192 : vector<11x256xf32>
    %194 = vector.extract_strided_slice %180 {offsets = [0, 0], sizes = [11, 256], strides = [1, 1]} : vector<12x256xf32> to vector<11x256xf32>
    %195 = arith.mulf %193, %194 : vector<11x256xf32>
    %196 = vector.broadcast %186 : vector<11x1xf32> to vector<11x256xf32>
    %197 = arith.subf %196, %189 : vector<11x256xf32>
    %198 = vector.broadcast %188 : vector<11x1xf32> to vector<11x256xf32>
    %199 = arith.mulf %197, %198 : vector<11x256xf32>
    %200 = vector.extract_strided_slice %180 {offsets = [1, 0], sizes = [11, 256], strides = [1, 1]} : vector<12x256xf32> to vector<11x256xf32>
    %201 = arith.mulf %199, %200 : vector<11x256xf32>
    %202 = arith.addf %195, %201 : vector<11x256xf32>
    %c1_96 = arith.constant 1 : index
    %c0_97 = arith.constant 0 : index
    %c18_98 = arith.constant 18 : index
    %203 = vector.load %arg2[%c1_96, %c0_97, %c18_98] : memref<3x15x22xf32, #tpu.memory_space<vmem>>, vector<1x10x1xf32>
    %204 = vector.shape_cast %203 : vector<1x10x1xf32> to vector<10x1xf32>
    %c1_99 = arith.constant 1 : index
    %c0_100 = arith.constant 0 : index
    %c19_101 = arith.constant 19 : index
    %205 = vector.load %arg2[%c1_99, %c0_100, %c19_101] : memref<3x15x22xf32, #tpu.memory_space<vmem>>, vector<1x10x1xf32>
    %206 = vector.shape_cast %205 : vector<1x10x1xf32> to vector<10x1xf32>
    %c1_102 = arith.constant 1 : index
    %c0_103 = arith.constant 0 : index
    %c20_104 = arith.constant 20 : index
    %207 = vector.load %arg2[%c1_102, %c0_103, %c20_104] : memref<3x15x22xf32, #tpu.memory_space<vmem>>, vector<1x10x1xf32>
    %208 = vector.shape_cast %207 : vector<1x10x1xf32> to vector<10x1xf32>
    %c1_105 = arith.constant 1 : index
    %c0_106 = arith.constant 0 : index
    %c21_107 = arith.constant 21 : index
    %209 = vector.load %arg2[%c1_105, %c0_106, %c21_107] : memref<3x15x22xf32, #tpu.memory_space<vmem>>, vector<1x10x1xf32>
    %210 = vector.shape_cast %209 : vector<1x10x1xf32> to vector<10x1xf32>
    %211 = vector.extract_strided_slice %117 {offsets = [0, 0], sizes = [10, 256], strides = [1, 1]} : vector<14x256xf32> to vector<10x256xf32>
    %212 = vector.broadcast %204 : vector<10x1xf32> to vector<10x256xf32>
    %213 = arith.subf %211, %212 : vector<10x256xf32>
    %214 = vector.broadcast %206 : vector<10x1xf32> to vector<10x256xf32>
    %215 = arith.mulf %213, %214 : vector<10x256xf32>
    %216 = vector.extract_strided_slice %202 {offsets = [0, 0], sizes = [10, 256], strides = [1, 1]} : vector<11x256xf32> to vector<10x256xf32>
    %217 = arith.mulf %215, %216 : vector<10x256xf32>
    %218 = vector.broadcast %208 : vector<10x1xf32> to vector<10x256xf32>
    %219 = arith.subf %218, %211 : vector<10x256xf32>
    %220 = vector.broadcast %210 : vector<10x1xf32> to vector<10x256xf32>
    %221 = arith.mulf %219, %220 : vector<10x256xf32>
    %222 = vector.extract_strided_slice %202 {offsets = [1, 0], sizes = [10, 256], strides = [1, 1]} : vector<11x256xf32> to vector<10x256xf32>
    %223 = arith.mulf %221, %222 : vector<10x256xf32>
    %224 = arith.addf %217, %223 : vector<10x256xf32>
    %c1_108 = arith.constant 1 : index
    %c0_109 = arith.constant 0 : index
    %c0_110 = arith.constant 0 : index
    %225 = vector.load %arg3[%c1_108, %c0_109, %c0_110] : memref<3x2x10xf32, #tpu.memory_space<vmem>>, vector<1x2x10xf32>
    %226 = vector.shape_cast %225 : vector<1x2x10xf32> to vector<2x10xf32>
    %cst_111 = arith.constant dense<0.000000e+00> : vector<2x256xf32>
    %227 = tpu.matmul %226, %224, %cst_111 {dimension_numbers = #tpu.dot_dimension_numbers<[1], [0], [0], [1], [0, 0, 1, 1], [], []>} : vector<2x10xf32>, vector<10x256xf32>, vector<2x256xf32> -> vector<2x256xf32>
    %228 = arith.addf %114, %227 : vector<2x256xf32>
    %c2_112 = arith.constant 2 : index
    %c0_113 = arith.constant 0 : index
    %229 = vector.load %arg1[%c2_112, %c0_113] : memref<3x256xf32, #tpu.memory_space<vmem>>, vector<1x256xf32>
    %230 = vector.shape_cast %229 : vector<1x256xf32> to vector<1x256xf32>
    %231 = vector.broadcast %230 : vector<1x256xf32> to vector<14x256xf32>
    %c2_114 = arith.constant 2 : index
    %c0_115 = arith.constant 0 : index
    %c2_116 = arith.constant 2 : index
    %232 = vector.load %arg2[%c2_114, %c0_115, %c2_116] : memref<3x15x22xf32, #tpu.memory_space<vmem>>, vector<1x14x1xf32>
    %233 = vector.shape_cast %232 : vector<1x14x1xf32> to vector<14x1xf32>
    %c2_117 = arith.constant 2 : index
    %c0_118 = arith.constant 0 : index
    %c3_119 = arith.constant 3 : index
    %234 = vector.load %arg2[%c2_117, %c0_118, %c3_119] : memref<3x15x22xf32, #tpu.memory_space<vmem>>, vector<1x14x1xf32>
    %235 = vector.shape_cast %234 : vector<1x14x1xf32> to vector<14x1xf32>
    %c2_120 = arith.constant 2 : index
    %c0_121 = arith.constant 0 : index
    %c4_122 = arith.constant 4 : index
    %236 = vector.load %arg2[%c2_120, %c0_121, %c4_122] : memref<3x15x22xf32, #tpu.memory_space<vmem>>, vector<1x14x1xf32>
    %237 = vector.shape_cast %236 : vector<1x14x1xf32> to vector<14x1xf32>
    %c2_123 = arith.constant 2 : index
    %c0_124 = arith.constant 0 : index
    %c5_125 = arith.constant 5 : index
    %238 = vector.load %arg2[%c2_123, %c0_124, %c5_125] : memref<3x15x22xf32, #tpu.memory_space<vmem>>, vector<1x14x1xf32>
    %239 = vector.shape_cast %238 : vector<1x14x1xf32> to vector<14x1xf32>
    %240 = vector.broadcast %233 : vector<14x1xf32> to vector<14x256xf32>
    %241 = arith.subf %231, %240 : vector<14x256xf32>
    %242 = vector.broadcast %235 : vector<14x1xf32> to vector<14x256xf32>
    %243 = arith.mulf %241, %242 : vector<14x256xf32>
    %244 = vector.broadcast %237 : vector<14x1xf32> to vector<14x256xf32>
    %245 = arith.subf %244, %231 : vector<14x256xf32>
    %246 = vector.broadcast %239 : vector<14x1xf32> to vector<14x256xf32>
    %247 = arith.mulf %245, %246 : vector<14x256xf32>
    %248 = arith.minimumf %243, %247 : vector<14x256xf32>
    %cst_126 = arith.constant 0.000000e+00 : f32
    %249 = vector.broadcast %cst_126 : f32 to vector<14x256xf32>
    %250 = arith.maximumf %249, %248 : vector<14x256xf32>
    %c2_127 = arith.constant 2 : index
    %c0_128 = arith.constant 0 : index
    %c6_129 = arith.constant 6 : index
    %251 = vector.load %arg2[%c2_127, %c0_128, %c6_129] : memref<3x15x22xf32, #tpu.memory_space<vmem>>, vector<1x13x1xf32>
    %252 = vector.shape_cast %251 : vector<1x13x1xf32> to vector<13x1xf32>
    %c2_130 = arith.constant 2 : index
    %c0_131 = arith.constant 0 : index
    %c7_132 = arith.constant 7 : index
    %253 = vector.load %arg2[%c2_130, %c0_131, %c7_132] : memref<3x15x22xf32, #tpu.memory_space<vmem>>, vector<1x13x1xf32>
    %254 = vector.shape_cast %253 : vector<1x13x1xf32> to vector<13x1xf32>
    %c2_133 = arith.constant 2 : index
    %c0_134 = arith.constant 0 : index
    %c8_135 = arith.constant 8 : index
    %255 = vector.load %arg2[%c2_133, %c0_134, %c8_135] : memref<3x15x22xf32, #tpu.memory_space<vmem>>, vector<1x13x1xf32>
    %256 = vector.shape_cast %255 : vector<1x13x1xf32> to vector<13x1xf32>
    %c2_136 = arith.constant 2 : index
    %c0_137 = arith.constant 0 : index
    %c9_138 = arith.constant 9 : index
    %257 = vector.load %arg2[%c2_136, %c0_137, %c9_138] : memref<3x15x22xf32, #tpu.memory_space<vmem>>, vector<1x13x1xf32>
    %258 = vector.shape_cast %257 : vector<1x13x1xf32> to vector<13x1xf32>
    %259 = vector.extract_strided_slice %231 {offsets = [0, 0], sizes = [13, 256], strides = [1, 1]} : vector<14x256xf32> to vector<13x256xf32>
    %260 = vector.broadcast %252 : vector<13x1xf32> to vector<13x256xf32>
    %261 = arith.subf %259, %260 : vector<13x256xf32>
    %262 = vector.broadcast %254 : vector<13x1xf32> to vector<13x256xf32>
    %263 = arith.mulf %261, %262 : vector<13x256xf32>
    %264 = vector.extract_strided_slice %250 {offsets = [0, 0], sizes = [13, 256], strides = [1, 1]} : vector<14x256xf32> to vector<13x256xf32>
    %265 = arith.mulf %263, %264 : vector<13x256xf32>
    %266 = vector.broadcast %256 : vector<13x1xf32> to vector<13x256xf32>
    %267 = arith.subf %266, %259 : vector<13x256xf32>
    %268 = vector.broadcast %258 : vector<13x1xf32> to vector<13x256xf32>
    %269 = arith.mulf %267, %268 : vector<13x256xf32>
    %270 = vector.extract_strided_slice %250 {offsets = [1, 0], sizes = [13, 256], strides = [1, 1]} : vector<14x256xf32> to vector<13x256xf32>
    %271 = arith.mulf %269, %270 : vector<13x256xf32>
    %272 = arith.addf %265, %271 : vector<13x256xf32>
    %c2_139 = arith.constant 2 : index
    %c0_140 = arith.constant 0 : index
    %c10_141 = arith.constant 10 : index
    %273 = vector.load %arg2[%c2_139, %c0_140, %c10_141] : memref<3x15x22xf32, #tpu.memory_space<vmem>>, vector<1x12x1xf32>
    %274 = vector.shape_cast %273 : vector<1x12x1xf32> to vector<12x1xf32>
    %c2_142 = arith.constant 2 : index
    %c0_143 = arith.constant 0 : index
    %c11_144 = arith.constant 11 : index
    %275 = vector.load %arg2[%c2_142, %c0_143, %c11_144] : memref<3x15x22xf32, #tpu.memory_space<vmem>>, vector<1x12x1xf32>
    %276 = vector.shape_cast %275 : vector<1x12x1xf32> to vector<12x1xf32>
    %c2_145 = arith.constant 2 : index
    %c0_146 = arith.constant 0 : index
    %c12_147 = arith.constant 12 : index
    %277 = vector.load %arg2[%c2_145, %c0_146, %c12_147] : memref<3x15x22xf32, #tpu.memory_space<vmem>>, vector<1x12x1xf32>
    %278 = vector.shape_cast %277 : vector<1x12x1xf32> to vector<12x1xf32>
    %c2_148 = arith.constant 2 : index
    %c0_149 = arith.constant 0 : index
    %c13_150 = arith.constant 13 : index
    %279 = vector.load %arg2[%c2_148, %c0_149, %c13_150] : memref<3x15x22xf32, #tpu.memory_space<vmem>>, vector<1x12x1xf32>
    %280 = vector.shape_cast %279 : vector<1x12x1xf32> to vector<12x1xf32>
    %281 = vector.extract_strided_slice %231 {offsets = [0, 0], sizes = [12, 256], strides = [1, 1]} : vector<14x256xf32> to vector<12x256xf32>
    %282 = vector.broadcast %274 : vector<12x1xf32> to vector<12x256xf32>
    %283 = arith.subf %281, %282 : vector<12x256xf32>
    %284 = vector.broadcast %276 : vector<12x1xf32> to vector<12x256xf32>
    %285 = arith.mulf %283, %284 : vector<12x256xf32>
    %286 = vector.extract_strided_slice %272 {offsets = [0, 0], sizes = [12, 256], strides = [1, 1]} : vector<13x256xf32> to vector<12x256xf32>
    %287 = arith.mulf %285, %286 : vector<12x256xf32>
    %288 = vector.broadcast %278 : vector<12x1xf32> to vector<12x256xf32>
    %289 = arith.subf %288, %281 : vector<12x256xf32>
    %290 = vector.broadcast %280 : vector<12x1xf32> to vector<12x256xf32>
    %291 = arith.mulf %289, %290 : vector<12x256xf32>
    %292 = vector.extract_strided_slice %272 {offsets = [1, 0], sizes = [12, 256], strides = [1, 1]} : vector<13x256xf32> to vector<12x256xf32>
    %293 = arith.mulf %291, %292 : vector<12x256xf32>
    %294 = arith.addf %287, %293 : vector<12x256xf32>
    %c2_151 = arith.constant 2 : index
    %c0_152 = arith.constant 0 : index
    %c14_153 = arith.constant 14 : index
    %295 = vector.load %arg2[%c2_151, %c0_152, %c14_153] : memref<3x15x22xf32, #tpu.memory_space<vmem>>, vector<1x11x1xf32>
    %296 = vector.shape_cast %295 : vector<1x11x1xf32> to vector<11x1xf32>
    %c2_154 = arith.constant 2 : index
    %c0_155 = arith.constant 0 : index
    %c15_156 = arith.constant 15 : index
    %297 = vector.load %arg2[%c2_154, %c0_155, %c15_156] : memref<3x15x22xf32, #tpu.memory_space<vmem>>, vector<1x11x1xf32>
    %298 = vector.shape_cast %297 : vector<1x11x1xf32> to vector<11x1xf32>
    %c2_157 = arith.constant 2 : index
    %c0_158 = arith.constant 0 : index
    %c16_159 = arith.constant 16 : index
    %299 = vector.load %arg2[%c2_157, %c0_158, %c16_159] : memref<3x15x22xf32, #tpu.memory_space<vmem>>, vector<1x11x1xf32>
    %300 = vector.shape_cast %299 : vector<1x11x1xf32> to vector<11x1xf32>
    %c2_160 = arith.constant 2 : index
    %c0_161 = arith.constant 0 : index
    %c17_162 = arith.constant 17 : index
    %301 = vector.load %arg2[%c2_160, %c0_161, %c17_162] : memref<3x15x22xf32, #tpu.memory_space<vmem>>, vector<1x11x1xf32>
    %302 = vector.shape_cast %301 : vector<1x11x1xf32> to vector<11x1xf32>
    %303 = vector.extract_strided_slice %231 {offsets = [0, 0], sizes = [11, 256], strides = [1, 1]} : vector<14x256xf32> to vector<11x256xf32>
    %304 = vector.broadcast %296 : vector<11x1xf32> to vector<11x256xf32>
    %305 = arith.subf %303, %304 : vector<11x256xf32>
    %306 = vector.broadcast %298 : vector<11x1xf32> to vector<11x256xf32>
    %307 = arith.mulf %305, %306 : vector<11x256xf32>
    %308 = vector.extract_strided_slice %294 {offsets = [0, 0], sizes = [11, 256], strides = [1, 1]} : vector<12x256xf32> to vector<11x256xf32>
    %309 = arith.mulf %307, %308 : vector<11x256xf32>
    %310 = vector.broadcast %300 : vector<11x1xf32> to vector<11x256xf32>
    %311 = arith.subf %310, %303 : vector<11x256xf32>
    %312 = vector.broadcast %302 : vector<11x1xf32> to vector<11x256xf32>
    %313 = arith.mulf %311, %312 : vector<11x256xf32>
    %314 = vector.extract_strided_slice %294 {offsets = [1, 0], sizes = [11, 256], strides = [1, 1]} : vector<12x256xf32> to vector<11x256xf32>
    %315 = arith.mulf %313, %314 : vector<11x256xf32>
    %316 = arith.addf %309, %315 : vector<11x256xf32>
    %c2_163 = arith.constant 2 : index
    %c0_164 = arith.constant 0 : index
    %c18_165 = arith.constant 18 : index
    %317 = vector.load %arg2[%c2_163, %c0_164, %c18_165] : memref<3x15x22xf32, #tpu.memory_space<vmem>>, vector<1x10x1xf32>
    %318 = vector.shape_cast %317 : vector<1x10x1xf32> to vector<10x1xf32>
    %c2_166 = arith.constant 2 : index
    %c0_167 = arith.constant 0 : index
    %c19_168 = arith.constant 19 : index
    %319 = vector.load %arg2[%c2_166, %c0_167, %c19_168] : memref<3x15x22xf32, #tpu.memory_space<vmem>>, vector<1x10x1xf32>
    %320 = vector.shape_cast %319 : vector<1x10x1xf32> to vector<10x1xf32>
    %c2_169 = arith.constant 2 : index
    %c0_170 = arith.constant 0 : index
    %c20_171 = arith.constant 20 : index
    %321 = vector.load %arg2[%c2_169, %c0_170, %c20_171] : memref<3x15x22xf32, #tpu.memory_space<vmem>>, vector<1x10x1xf32>
    %322 = vector.shape_cast %321 : vector<1x10x1xf32> to vector<10x1xf32>
    %c2_172 = arith.constant 2 : index
    %c0_173 = arith.constant 0 : index
    %c21_174 = arith.constant 21 : index
    %323 = vector.load %arg2[%c2_172, %c0_173, %c21_174] : memref<3x15x22xf32, #tpu.memory_space<vmem>>, vector<1x10x1xf32>
    %324 = vector.shape_cast %323 : vector<1x10x1xf32> to vector<10x1xf32>
    %325 = vector.extract_strided_slice %231 {offsets = [0, 0], sizes = [10, 256], strides = [1, 1]} : vector<14x256xf32> to vector<10x256xf32>
    %326 = vector.broadcast %318 : vector<10x1xf32> to vector<10x256xf32>
    %327 = arith.subf %325, %326 : vector<10x256xf32>
    %328 = vector.broadcast %320 : vector<10x1xf32> to vector<10x256xf32>
    %329 = arith.mulf %327, %328 : vector<10x256xf32>
    %330 = vector.extract_strided_slice %316 {offsets = [0, 0], sizes = [10, 256], strides = [1, 1]} : vector<11x256xf32> to vector<10x256xf32>
    %331 = arith.mulf %329, %330 : vector<10x256xf32>
    %332 = vector.broadcast %322 : vector<10x1xf32> to vector<10x256xf32>
    %333 = arith.subf %332, %325 : vector<10x256xf32>
    %334 = vector.broadcast %324 : vector<10x1xf32> to vector<10x256xf32>
    %335 = arith.mulf %333, %334 : vector<10x256xf32>
    %336 = vector.extract_strided_slice %316 {offsets = [1, 0], sizes = [10, 256], strides = [1, 1]} : vector<11x256xf32> to vector<10x256xf32>
    %337 = arith.mulf %335, %336 : vector<10x256xf32>
    %338 = arith.addf %331, %337 : vector<10x256xf32>
    %c2_175 = arith.constant 2 : index
    %c0_176 = arith.constant 0 : index
    %c0_177 = arith.constant 0 : index
    %339 = vector.load %arg3[%c2_175, %c0_176, %c0_177] : memref<3x2x10xf32, #tpu.memory_space<vmem>>, vector<1x2x10xf32>
    %340 = vector.shape_cast %339 : vector<1x2x10xf32> to vector<2x10xf32>
    %cst_178 = arith.constant dense<0.000000e+00> : vector<2x256xf32>
    %341 = tpu.matmul %340, %338, %cst_178 {dimension_numbers = #tpu.dot_dimension_numbers<[1], [0], [0], [1], [0, 0, 1, 1], [], []>} : vector<2x10xf32>, vector<10x256xf32>, vector<2x256xf32> -> vector<2x256xf32>
    %342 = arith.addf %228, %341 : vector<2x256xf32>
    %c0_179 = arith.constant 0 : index
    %c0_180 = arith.constant 0 : index
    %343 = vector.load %arg4[%c0_179, %c0_180] : memref<2x256xf32, #tpu.memory_space<vmem>>, vector<2x256xf32>
    tpu.vector_store %arg4[%c0_179, %c0_180], %342 {strides = array<i32>} : memref<2x256xf32, #tpu.memory_space<vmem>>, vector<2x256xf32>,
    return
  }
  func.func @transform_0(%arg0: i32) -> (i32, i32) {
    %c0_i32 = arith.constant 0 : i32
    %c0_i32_0 = arith.constant 0 : i32
    return %c0_i32, %arg0 : i32, i32
  }
  func.func @transform_1(%arg0: i32) -> (i32, i32, i32) {
    %c0_i32 = arith.constant 0 : i32
    %c0_i32_0 = arith.constant 0 : i32
    %c0_i32_1 = arith.constant 0 : i32
    %c0_i32_2 = arith.constant 0 : i32
    return %c0_i32, %c0_i32_0, %c0_i32_1 : i32, i32, i32
  }
  func.func @transform_2(%arg0: i32) -> (i32, i32, i32) {
    %c0_i32 = arith.constant 0 : i32
    %c0_i32_0 = arith.constant 0 : i32
    %c0_i32_1 = arith.constant 0 : i32
    %c0_i32_2 = arith.constant 0 : i32
    return %c0_i32, %c0_i32_0, %c0_i32_1 : i32, i32, i32
  }
  func.func @transform_3(%arg0: i32) -> (i32, i32) {
    %c0_i32 = arith.constant 0 : i32
    %c0_i32_0 = arith.constant 0 : i32
    return %c0_i32, %arg0 : i32, i32
  }
}

</mosaic_0001>

<bundles_post_ra>
// kernel: forward.1
= control target key start
LH: loop header
LB: loop body
LE: loop exit
PB: predicated region body
PF: predicated region fallthrough
CT: control target
= control target key end

     0   :  { %8 = vsyncpa [#allocation3], 0  ;;  %s2708_s0 = inlined_call_operand.hbm [shape: f32[3,256], index: 0, kind: input, shape index: {}]   ;;  %s2709_s1 = inlined_call_operand.hbm [shape: f32[3,15,22], index: 1, kind: input, shape index: {}]   ;;  %s2710_s2 = inlined_call_operand.vmem [shape: f32[3,2,10], index: 2, kind: input, shape index: {}]   ;;  %s2711_s3 = inlined_call_operand.hbm [shape: f32[2,256], index: 3, kind: output, shape index: {}]  }
   0x1   :  { %9 = vsyncpa [#allocation6], 0 }
   0x2   :  { %10 = vsyncpa [#allocation4], 0  ;;  %s1690_s12 = smov [#allocation2]   ;;  %s1691_s14 = smov [#allocation5]  }
   0x3   :  { %s17_s13 = sshll.u32 %s1690_s12, 4  ;;  %s26_s15 = sshll.u32 %s1691_s14, 4  ;;  %s18_s13 = int_to_ptr.vmem [resolvable:$true] %s17_s13  ;;  %s1737_s15 = int_to_ptr.vmem [resolvable:$true] %s26_s15 }
   0x4   :  { %s1618_s18 = scalar_lea.hbm %s2708_s0, 128 }
   0x5   :  { %p1619_p0 = scmp.ne.s32.totalorder %s2708_s0, %s1618_s18  ;;  %p1622_p1 = scmp.lt.u32.totalorder %s1618_s18, %s2708_s0 }
   0x7   :  { %p1624_p2 = pnand %p1622_p1, %p1619_p0 }
   0x9   :  { %1627 = shalt.err (!%p1624_p2)
}
   0xa   :  { %s1628_s23 = scalar_lea.vmem %s18_s13, 128  ;;  %p1633_p4 = scmp.lt.s32.totalorder %s18_s13, %s18_s13 }
   0xb   :  { %p1629_p3 = scmp.ne.s32.totalorder %s18_s13, %s1628_s23  ;;  %p1634_p5 = scmp.lt.s32.totalorder %s1628_s23, %s1628_s23 }
   0xd   :  { %p1635_p6 = por %p1634_p5, %p1633_p4 }
   0xf   :  { %p1636_p7 = pnand %p1635_p6, %p1629_p3 }
  0x11   :  { %1639 = shalt.err (!%p1636_p7)
}
  0x12   :  { %20 = dma.hbm_to_vmem [thread:$0]  %s2708_s0, 128, %s18_s13, [#allocation3]  }
  0x13   :  { %s1640_s28 = scalar_lea.hbm %s2709_s1, 768 }
  0x14   :  { %p1641_p8 = scmp.ne.s32.totalorder %s2709_s1, %s1640_s28  ;;  %p1644_p9 = scmp.lt.u32.totalorder %s1640_s28, %s2709_s1 }
  0x16   :  { %p1646_p10 = pnand %p1644_p9, %p1641_p8 }
  0x18   :  { %1649 = shalt.err (!%p1646_p10)
}
  0x19   :  { %s1650_s6 = scalar_lea.vmem %s1737_s15, 768  ;;  %p1655_p12 = scmp.lt.s32.totalorder %s1737_s15, %s1737_s15 }
  0x1a   :  { %p1651_p11 = scmp.ne.s32.totalorder %s1737_s15, %s1650_s6  ;;  %p1656_p13 = scmp.lt.s32.totalorder %s1650_s6, %s1650_s6 }
  0x1c   :  { %p1657_p0 = por %p1656_p13, %p1655_p12 }
  0x1e   :  { %p1658_p1 = pnand %p1657_p0, %p1651_p11 }
  0x20   :  { %1661 = shalt.err (!%p1658_p1)
}
  0x21   :  { %s1692_s0 = smov 128   ;;  %s1693_s7 = smov 8  }
  0x22   :  { %32 = dma.hbm_to_vmem [thread:$0]  %s2709_s1, 768, %s1737_s15, [#allocation6], %s1692_s0, %s1692_s0, %s1693_s7  }
  0x23   :  { %1684 = dma.done.wait [#allocation3], 128  }
  0x24   :  { %1685 = vsyncadd [#allocation3], 4294967168 }
  0x25   :  { %1686 = dma.done.wait [#allocation6], 768  }
  0x26   :  { %1687 = vsyncadd [#allocation6], 4294966528  ;;  %v1694_v0 = vmov 3   ;;  %v1695_v1 = vmov 2   ;;  %v1770_v2 = vld [vmem:[#allocation5] sm:$0xff]  ;;  %v1696_v5 = vmov 4   ;;  %v43_v33 = vlaneseq }
  0x27   :  { %1537 = vset.pattern.permute.xlu1 %v1694_v0  ;;  %1536 = vset.pattern.permute.xlu0 %v1695_v1  ;;  %v54_v3 = vld [vmem:[#allocation5 + $0x8] sm:$0x3f]  ;;  %v1774_v4 = vld [vmem:[#allocation5 + $0x18] sm:$0x3f]  ;;  %v1778_v6 = vld [vmem:[#allocation5 + $0x20] sm:$0xff]  ;;  %v1697_v7 = vmov 5  }
  0x28   :  { %70 = vperm.xlu1 %1537, %v1770_v2   ;;  %57 = vperm.xlu0 %1536, %v1770_v2   ;;  %v1698_v8 = vmov 6   ;;  %v114_v9 = vld [vmem:[#allocation5 + $0x8] sm:$0x1f]  ;;  %v1699_v10 = vmov 7   ;;  %v1700_v11 = vmov 8   ;;  %v1701_v12 = vmov 9  }
  0x29   :  { %v1798_v13 = vld [vmem:[#allocation5 + $0x18] sm:$0x1f]  ;;  %v193_v14 = vld [vmem:[#allocation5 + $0x8] sm:$0xf]  ;;  %v1702_v15 = vmov 10   ;;  %v1703_v16 = vmov 11  }
  0x2a   :  { %v1704_v17 = vmov 12   ;;  %v2726_v18 = vmov 13   ;;  %v2724_v19 = vmov 14   ;;  %v2720_v20 = vmov 15   ;;  %v1821_v21 = vld [vmem:[#allocation5 + $0x8] sm:$0x7] }
  0x2b   :  { %v1826_v22 = vld [vmem:[#allocation5 + $0x18] sm:$0xf]  ;;  %v2722_v23 = vmov 16   ;;  %v2718_v24 = vmov 17   ;;  %v2716_v25 = vmov 18   ;;  %v2712_v27 = vmov 19  }
  0x2c   :  { %74 = vperm.xlu1 %1537, %v54_v3   ;;  %62 = vperm.xlu0 %1536, %v54_v3   ;;  %v1838_v26 = vld [vmem:[#allocation5 + $0x8] sm:$0x3]  ;;  %v2714_v28 = vmov 20   ;;  %v2728_v29 = vmov 21   ;;  %v1853_v30 = vld [vmem:[#allocation5 + $0x10] sm:$0xff]  ;;  %v44_v36 = vshrl.u32 %v43_v33, 7 }
  0x2d   :  { %v1859_v31 = vld [vmem:[#allocation5 + $0x18] sm:$0x7]  ;;  %v1866_v35 = vld [vmem:[#allocation5 + $0x28] sm:$0x3f]  ;;  %vm173_vm0 = vcmask 1046528   ;;  %vm819_vm1 = vcmask 1041408  }
  0x2e   :  { %v45_v39 = vsub.s32 0, %v44_v36  ;;  %v49_v40 = vsub.s32 1, %v44_v36  ;;  %v978_v42 = vld [vmem:[#allocation2 + $0x2] ss:$4 sm:$0x3]  ;;  %vm1715_vm2 = vmmov 1  }
  0x2f   :  { %v41_v43 = vld [vmem:[#allocation2] ss:$4 sm:$0x3]  ;;  %v428_v56 = vld [vmem:[#allocation2 + $0x1] ss:$4 sm:$0x3]  ;;  %vm2585_vm3 = vmpackc.low %vm819_vm1, %vm1715_vm2 }
  0x30   :  { %1538 = vset.pattern.permute.xlu1 %v1696_v5  ;;  %450 = vperm.xlu0 %1536, %v1774_v4   ;;  %v1881_v45 = vrot.slane %v978_v42, %v45_v39  ;;  %v1883_v46 = vrot.slane %v978_v42, %v49_v40  ;;  %v1885_v47 = vrot.slane %v41_v43, %v45_v39  ;;  %vm815_vm4 = vcmask 80896   ;;  %s1716_s15 = smov [#allocation7]  }
  0x31   :  { %86 = vperm.xlu1 %1538, %v54_v3   ;;  %v1887_v48 = vrot.slane %v41_v43, %v49_v40  ;;  %s1465_s16 = sshll.u32 %s1716_s15, 4  ;;  %s1466_s16 = int_to_ptr.vmem [resolvable:$true] %s1465_s16 }
  0x32   :  { %s1662_s17 = scalar_lea.vmem %s1466_s16, 64  ;;  %p1667_p3 = scmp.lt.s32.totalorder %s1466_s16, %s1466_s16 }
  0x33   :  { %p1663_p2 = scmp.ne.s32.totalorder %s1466_s16, %s1662_s17  ;;  %p1668_p4 = scmp.lt.s32.totalorder %s1662_s17, %s1662_s17 }
  0x34   :  { %995 = vperm.xlu0 %1536, %v1778_v6  }
  0x35   :  { %1539 = vset.pattern.permute.xlu1 %v1697_v7  ;;  %p1669_p5 = por %p1668_p4, %p1667_p3 }
  0x36   :  { %94 = vperm.xlu1 %1539, %v1770_v2  }
  0x37   :  { %p1670_p6 = pnand %p1669_p5, %p1663_p2 }
  0x38   :  { %1558 = vset.pattern.permute.xlu0 %v1696_v5 }
  0x39   :  { %82 = vperm.xlu0 %1558, %v1770_v2  }
  0x3a   :  { %1540 = vset.pattern.permute.xlu1 %v1698_v8 }
  0x3b   :  { %117 = vperm.xlu1 %1540, %v1770_v2  }
  0x3d   :  { %1020 = vperm.xlu0 %1558, %v1778_v6  }
  0x3f   :  { %122 = vperm.xlu1 %1540, %v114_v9  }
  0x41   :  { %1562 = vset.pattern.permute.xlu0 %v1694_v0 }
  0x42   :  { %462 = vperm.xlu0 %1562, %v1774_v4  }
  0x43   :  { %1541 = vset.pattern.permute.xlu1 %v1699_v10 }
  0x44   :  { %134 = vperm.xlu1 %1541, %v114_v9  }
  0x46   :  { %1008 = vperm.xlu0 %1562, %v1778_v6  }
  0x48   :  { %1542 = vset.pattern.permute.xlu1 %v1700_v11 }
  0x49   :  { %146 = vperm.xlu1 %1542, %v1770_v2  }
  0x4a   :  { %1564 = vset.pattern.permute.xlu0 %v1697_v7 }
  0x4b   :  { %98 = vperm.xlu0 %1564, %v54_v3   ;;  %v1905_v3 = vrot.slane %v428_v56, %v49_v40 }
  0x4d   :  { %1543 = vset.pattern.permute.xlu1 %v1701_v12 }
  0x4e   :  { %158 = vperm.xlu1 %1543, %v1770_v2  }
  0x4f   :  { %1032 = vperm.xlu0 %1564, %v1778_v6  }
  0x52   :  { %162 = vperm.xlu1 %1543, %v114_v9  }
  0x53   :  { %1568 = vset.pattern.permute.xlu0 %v1698_v8 }
  0x54   :  { %510 = vperm.xlu0 %1568, %v1798_v13  }
  0x56   :  { %1544 = vset.pattern.permute.xlu1 %v1702_v15 }
  0x57   :  { %201 = vperm.xlu1 %1544, %v193_v14  }
  0x58   :  { %1055 = vperm.xlu0 %1568, %v1778_v6  }
  0x5b   :  { %1545 = vset.pattern.permute.xlu1 %v1703_v16 }
  0x5c   :  { %209 = vperm.xlu1 %1545, %v1770_v2   ;;  %1570 = vset.pattern.permute.xlu0 %v1700_v11 }
  0x5d   :  { %150 = vperm.xlu0 %1570, %v114_v9  }
  0x60   :  { %1546 = vset.pattern.permute.xlu1 %v1704_v17 }
  0x61   :  { %225 = vperm.xlu1 %1546, %v1770_v2   ;;  %1084 = vperm.xlu0 %1570, %v1778_v6  }
  0x65   :  { %229 = vperm.xlu1 %1546, %v193_v14   ;;  %1572 = vset.pattern.permute.xlu0 %v1699_v10 }
  0x66   :  { %130 = vperm.xlu0 %1572, %v1770_v2  }
  0x69   :  { %1547 = vset.pattern.permute.xlu1 %v2726_v18 }
  0x6a   :  { %241 = vperm.xlu1 %1547, %v193_v14   ;;  %522 = vperm.xlu0 %1572, %v1798_v13  }
  0x6e   :  { %1548 = vset.pattern.permute.xlu1 %v2724_v19  ;;  %1068 = vperm.xlu0 %1572, %v1778_v6  }
  0x6f   :  { %274 = vperm.xlu1 %1548, %v1770_v2  }
  0x72   :  { %1577 = vset.pattern.permute.xlu0 %v1701_v12 }
  0x73   :  { %1549 = vset.pattern.permute.xlu1 %v2720_v20  ;;  %1096 = vperm.xlu0 %1577, %v1778_v6  }
  0x74   :  { %287 = vperm.xlu1 %1549, %v1770_v2  }
  0x77   :  { %1578 = vset.pattern.permute.xlu0 %v1702_v15 }
  0x78   :  { %291 = vperm.xlu1 %1549, %v1821_v21   ;;  %196 = vperm.xlu0 %1578, %v1770_v2  }
  0x7c   :  { %1550 = vset.pattern.permute.xlu1 %v2722_v23  ;;  %588 = vperm.xlu0 %1578, %v1826_v22  }
  0x7d   :  { %307 = vperm.xlu1 %1550, %v1821_v21  }
  0x80   :  { %1133 = vperm.xlu0 %1578, %v1778_v6  }
  0x81   :  { %1551 = vset.pattern.permute.xlu1 %v2718_v24 }
  0x82   :  { %315 = vperm.xlu1 %1551, %v1770_v2  }
  0x84   :  { %1583 = vset.pattern.permute.xlu0 %v1704_v17 }
  0x85   :  { %1162 = vperm.xlu0 %1583, %v1778_v6  }
  0x86   :  { %1552 = vset.pattern.permute.xlu1 %v2716_v25 }
  0x87   :  { %352 = vperm.xlu1 %1552, %v1770_v2  }
  0x89   :  { %1584 = vset.pattern.permute.xlu0 %v1703_v16 }
  0x8a   :  { %213 = vperm.xlu0 %1584, %v193_v14  }
  0x8b   :  { %357 = vperm.xlu1 %1552, %v1838_v26  }
  0x8e   :  { %600 = vperm.xlu0 %1584, %v1826_v22  }
  0x8f   :  { %1553 = vset.pattern.permute.xlu1 %v2712_v27 }
  0x90   :  { %369 = vperm.xlu1 %1553, %v1838_v26  }
  0x92   :  { %1146 = vperm.xlu0 %1584, %v1778_v6  }
  0x94   :  { %1554 = vset.pattern.permute.xlu1 %v2714_v28 }
  0x95   :  { %381 = vperm.xlu1 %1554, %v1770_v2  }
  0x96   :  { %1588 = vset.pattern.permute.xlu0 %v2726_v18 }
  0x97   :  { %237 = vperm.xlu0 %1588, %v1770_v2  }
  0x99   :  { %1555 = vset.pattern.permute.xlu1 %v2728_v29 }
  0x9a   :  { %393 = vperm.xlu1 %1555, %v1770_v2  }
  0x9b   :  { %1174 = vperm.xlu0 %1588, %v1778_v6  }
  0x9e   :  { %1556 = vset.pattern.permute.xlu1 %v1695_v1 }
  0x9f   :  { %445 = vperm.xlu1 %1556, %v1853_v30   ;;  %1590 = vset.pattern.permute.xlu0 %v2724_v19 }
  0xa0   :  { %279 = vperm.xlu0 %1590, %v1821_v21  }
  0xa3   :  { %1557 = vset.pattern.permute.xlu1 %v1696_v5 }
  0xa4   :  { %470 = vperm.xlu1 %1557, %v1853_v30   ;;  %666 = vperm.xlu0 %1590, %v1859_v31  }
  0xa7   :  { %v71_v32 = vpop.permute.xlu1 %70  ;;  %v58_v34 = vpop.permute.xlu0 %57 }
  0xa8   :  { %474 = vperm.xlu1 %1557, %v1774_v4   ;;  %1211 = vperm.xlu0 %1590, %v1778_v6   ;;  %v65_v53 = vsub.f32 %v1885_v47, %v58_v34  ;;  %v66_v54 = vsub.f32 %v1887_v48, %v58_v34 }
  0xaa   :  { %v77_v60 = vmul.f32 %v71_v32, %v65_v53  ;;  %v78_v61 = vmul.f32 %v71_v32, %v66_v54 }
  0xab   :  { %v1868_v37 = vpop.permute.xlu1 %74  ;;  %v1870_v38 = vpop.permute.xlu0 %62 }
  0xac   :  { %1559 = vset.pattern.permute.xlu1 %v1695_v1  ;;  %1594 = vset.pattern.permute.xlu0 %v2722_v23  ;;  %v1903_v1 = vrot.slane %v428_v56, %v45_v39  ;;  %v68_v53 = vsub.f32 %v1887_v48, %v1870_v38 }
  0xad   :  { %1000 = vperm.xlu1 %1559, %v1866_v35   ;;  %303 = vperm.xlu0 %1594, %v1770_v2  }
  0xaf   :  { %v451_v41 = vpop.permute.xlu0 %450 }
  0xb0   :  { %v1876_v44 = vpop.permute.xlu1 %86  ;;  %v455_v32 = vsub.f32 %v1903_v1, %v451_v41  ;;  %v456_v36 = vsub.f32 %v1905_v3, %v451_v41 }
  0xb1   :  { %1560 = vset.pattern.permute.xlu1 %v1696_v5  ;;  %1240 = vperm.xlu0 %1594, %v1778_v6  }
  0xb2   :  { %1024 = vperm.xlu1 %1560, %v1866_v35  }
  0xb3   :  { %v996_v49 = vpop.permute.xlu0 %995 }
  0xb4   :  { %v1003_v50 = vsub.f32 %v1881_v45, %v996_v49  ;;  %v1004_v51 = vsub.f32 %v1883_v46, %v996_v49 }
  0xb5   :  { %v95_v52 = vpop.permute.xlu1 %94  ;;  %1598 = vset.pattern.permute.xlu0 %v2720_v20 }
  0xb6   :  { %1561 = vset.pattern.permute.xlu1 %v1694_v0  ;;  %674 = vperm.xlu0 %1598, %v1853_v30  }
  0xb7   :  { %458 = vperm.xlu1 %1561, %v1853_v30  }
  0xb8   :  { %v83_v55 = vpop.permute.xlu0 %82 }
  0xb9   :  { %v89_v57 = vsub.f32 %v83_v55, %v1885_v47  ;;  %v90_v58 = vsub.f32 %v83_v55, %v1887_v48  ;;  %v92_v55 = vsub.f32 %v1876_v44, %v1887_v48 }
  0xba   :  { %v1899_v59 = vpop.permute.xlu1 %117  ;;  %1599 = vset.pattern.permute.xlu0 %v2718_v24 }
  0xbb   :  { %v101_v62 = vmul.f32 %v95_v52, %v89_v57  ;;  %v102_v63 = vmul.f32 %v95_v52, %v90_v58  ;;  %1563 = vset.pattern.permute.xlu1 %v1697_v7  ;;  %319 = vperm.xlu0 %1599, %v1821_v21  }
  0xbc   :  { %482 = vperm.xlu1 %1563, %v1853_v30   ;;  %v1021_v5 = vpop.permute.xlu0 %1020 }
  0xbd   :  { %v105_v9 = vmin.f32 %v77_v60, %v101_v62  ;;  %v106_v14 = vmin.f32 %v78_v61, %v102_v63  ;;  %v1027_v33 = vsub.f32 %v1021_v5, %v1881_v45  ;;  %v1028_v34 = vsub.f32 %v1021_v5, %v1883_v46 }
  0xbe   :  { %v1913_v42 = vpop.permute.xlu1 %122 }
  0xbf   :  { %706 = vperm.xlu0 %1599, %v1859_v31   ;;  %v1946_v58 = vmax.f32 %v105_v9, 0.0  ;;  %v1948_v60 = vmax.f32 %v106_v14, 0.0  ;;  %v1960_v9 = vld [vmem:[#allocation5 + $0x18] sm:$0x3] }
  0xc0   :  { %486 = vperm.xlu1 %1563, %v1774_v4   ;;  %v67_v4 = vsub.f32 %v1885_v47, %v1870_v38  ;;  %v80_v38 = vmul.f32 %v1868_v37, %v68_v53 }
  0xc1   :  { %v463_v21 = vpop.permute.xlu0 %462  ;;  %v174_v14 = vrot.slane %v1946_v58, 1 }
  0xc2   :  { %v1917_v39 = vmul.f32 %v463_v21, %v455_v32  ;;  %v1919_v40 = vmul.f32 %v463_v21, %v456_v36  ;;  %v177_v32 = vrot.slane %v1948_v60, 1 }
  0xc3   :  { %v1921_v43 = vpop.permute.xlu1 %134  ;;  %1252 = vperm.xlu0 %1599, %v1778_v6  }
  0xc4   :  { %1565 = vset.pattern.permute.xlu1 %v1694_v0  ;;  %v91_v0 = vsub.f32 %v1876_v44, %v1885_v47 }
  0xc5   :  { %1012 = vperm.xlu1 %1565, %v1866_v35   ;;  %v1009_v41 = vpop.permute.xlu0 %1008 }
  0xc6   :  { %v1926_v49 = vmul.f32 %v1009_v41, %v1003_v50  ;;  %v1928_v52 = vmul.f32 %v1009_v41, %v1004_v51  ;;  %v79_v51 = vmul.f32 %v1868_v37, %v67_v4 }
  0xc7   :  { %1604 = vset.pattern.permute.xlu0 %v2716_v25 }
  0xc8   :  { %v1935_v54 = vpop.permute.xlu1 %146  ;;  %739 = vperm.xlu0 %1604, %v1853_v30  }
  0xc9   :  { %1566 = vset.pattern.permute.xlu1 %v1697_v7 }
  0xca   :  { %1036 = vperm.xlu1 %1566, %v1866_v35   ;;  %v99_v50 = vpop.permute.xlu0 %98 }
  0xcb   :  { %v103_v56 = vmul.f32 %v99_v50, %v91_v0  ;;  %v104_v57 = vmul.f32 %v99_v50, %v92_v55 }
  0xcc   :  { %1605 = vset.pattern.permute.xlu0 %v2714_v28 }
  0xcd   :  { %v107_v61 = vmin.f32 %v79_v51, %v103_v56  ;;  %v108_v62 = vmin.f32 %v80_v38, %v104_v57  ;;  %v1951_v44 = vpop.permute.xlu1 %158  ;;  %385 = vperm.xlu0 %1605, %v1838_v26   ;;  %v1986_v56 = vld [vmem:[#allocation5 + $0x28] sm:$0x1f] }
  0xce   :  { %1567 = vset.pattern.permute.xlu1 %v1698_v8  ;;  %v1033_v7 = vpop.permute.xlu0 %1032 }
  0xcf   :  { %v111_v35 = vmax.f32 %v107_v61, 0.0  ;;  %v112_v63 = vmax.f32 %v108_v62, 0.0  ;;  %505 = vperm.xlu1 %1567, %v1853_v30   ;;  %v1956_v37 = vmul.f32 %v1033_v7, %v1027_v33  ;;  %v1958_v5 = vmul.f32 %v1033_v7, %v1028_v34 }
  0xd0   :  { %v127_v62 = vsub.f32 %v1885_v47, %v1913_v42  ;;  %v128_v7 = vsub.f32 %v1887_v48, %v1913_v42 }
  0xd1   :  { %v175_v36 = vrot.slane %v111_v35, 1  ;;  %v178_v21 = vrot.slane %v112_v63, 1  ;;  %v163_v41 = vpop.permute.xlu1 %162  ;;  %v1043_v4 = vmin.f32 %v1926_v49, %v1956_v37  ;;  %v1044_v53 = vmin.f32 %v1928_v52, %v1958_v5  ;;  %772 = vperm.xlu0 %1605, %v1960_v9  }
  0xd3   :  { %v176_v33 = vsel %vm173_vm0, %v174_v14, %v175_v36  ;;  %v179_v34 = vsel %vm173_vm0, %v177_v32, %v178_v21  ;;  %1569 = vset.pattern.permute.xlu1 %v1700_v11  ;;  %v1972_v0 = vpop.permute.xlu0 %510 }
  0xd4   :  { %534 = vperm.xlu1 %1569, %v1853_v30  }
  0xd5   :  { %1318 = vperm.xlu0 %1605, %v1778_v6  }
  0xd6   :  { %v1976_v55 = vpop.permute.xlu1 %201 }
  0xd7   :  { %v1978_v50 = vpop.permute.xlu0 %1055 }
  0xd8   :  { %538 = vperm.xlu1 %1569, %v1798_v13   ;;  %v1063_v51 = vsub.f32 %v1881_v45, %v1978_v50  ;;  %v1064_v38 = vsub.f32 %v1883_v46, %v1978_v50 }
  0xd9   :  { %1609 = vset.pattern.permute.xlu0 %v2712_v27  ;;  %v139_v27 = vmul.f32 %v1921_v43, %v127_v62 }
  0xda   :  { %365 = vperm.xlu0 %1609, %v1770_v2   ;;  %v140_v2 = vmul.f32 %v1921_v43, %v128_v7 }
  0xdb   :  { %v1989_v57 = vpop.permute.xlu1 %209  ;;  %v143_v20 = vmul.f32 %v139_v27, %v111_v35  ;;  %v125_v27 = vsub.f32 %v1885_v47, %v1899_v59 }
  0xdc   :  { %1571 = vset.pattern.permute.xlu1 %v1698_v8  ;;  %v151_v61 = vpop.permute.xlu0 %150  ;;  %v144_v23 = vmul.f32 %v140_v2, %v112_v63 }
  0xdd   :  { %v155_v14 = vsub.f32 %v151_v61, %v1885_v47  ;;  %v156_v32 = vsub.f32 %v151_v61, %v1887_v48  ;;  %1060 = vperm.xlu1 %1571, %v1986_v56  }
  0xde   :  { %752 = vperm.xlu0 %1609, %v1853_v30  }
  0xdf   :  { %v167_v28 = vmul.f32 %v163_v41, %v155_v14  ;;  %v168_v25 = vmul.f32 %v163_v41, %v156_v32 }
  0xe0   :  { %v2002_v8 = vpop.permute.xlu1 %225  ;;  %v1085_v24 = vpop.permute.xlu0 %1084 }
  0xe1   :  { %v186_v42 = vmul.f32 %v175_v36, %v167_v28  ;;  %v187_v19 = vmul.f32 %v178_v21, %v168_v25  ;;  %1573 = vset.pattern.permute.xlu1 %v1700_v11  ;;  %v1091_v61 = vsub.f32 %v1085_v24, %v1881_v45  ;;  %v1092_v18 = vsub.f32 %v1085_v24, %v1883_v46 }
  0xe2   :  { %1088 = vperm.xlu1 %1573, %v1986_v56   ;;  %1613 = vset.pattern.permute.xlu0 %v2728_v29  ;;  %v126_v25 = vsub.f32 %v1887_v48, %v1899_v59  ;;  %v153_v11 = vsub.f32 %v1935_v54, %v1885_v47  ;;  %v154_v24 = vsub.f32 %v1935_v54, %v1887_v48 }
  0xe3   :  { %v2008_v43 = vadd.f32 %v186_v42, %v143_v20  ;;  %v2010_v41 = vadd.f32 %v187_v19, %v144_v23  ;;  %784 = vperm.xlu0 %1613, %v1960_v9   ;;  %v515_v59 = vsub.f32 %v1903_v1, %v1972_v0  ;;  %v516_v36 = vsub.f32 %v1905_v3, %v1972_v0 }
  0xe4   :  { %v2021_v28 = vpop.permute.xlu1 %229  ;;  %v165_v20 = vmul.f32 %v1951_v44, %v153_v11  ;;  %v166_v23 = vmul.f32 %v1951_v44, %v154_v24 }
  0xe5   :  { %v131_v19 = vpop.permute.xlu0 %130 }
  0xe6   :  { %v137_v35 = vmul.f32 %v131_v19, %v125_v27  ;;  %v138_v63 = vmul.f32 %v131_v19, %v126_v25  ;;  %1574 = vset.pattern.permute.xlu1 %v1699_v10  ;;  %v184_v54 = vmul.f32 %v176_v33, %v165_v20  ;;  %v185_v21 = vmul.f32 %v179_v34, %v166_v23 }
  0xe7   :  { %518 = vperm.xlu1 %1574, %v1853_v30   ;;  %1330 = vperm.xlu0 %1613, %v1778_v6   ;;  %v253_v34 = vrot.slane %v2008_v43, 1  ;;  %v2048_v6 = vmax.f32 %v1043_v4, 0.0 }
  0xe8   :  { %v141_v62 = vmul.f32 %v137_v35, %v1946_v58  ;;  %v142_v7 = vmul.f32 %v138_v63, %v1948_v60  ;;  %v256_v58 = vrot.slane %v2010_v41, 1  ;;  %v2053_v60 = vmax.f32 %v1044_v53, 0.0 }
  0xe9   :  { %v2035_v44 = vpop.permute.xlu1 %241  ;;  %v523_v14 = vpop.permute.xlu0 %522 }
  0xea   :  { %v188_v32 = vadd.f32 %v184_v54, %v141_v62  ;;  %v189_v2 = vadd.f32 %v185_v21, %v142_v7  ;;  %v2038_v42 = vmul.f32 %v523_v14, %v515_v59  ;;  %v2040_v0 = vmul.f32 %v523_v14, %v516_v36 }
  0xeb   :  { %1575 = vset.pattern.permute.xlu1 %v1701_v12 }
  0xec   :  { %v252_v27 = vrot.slane %v188_v32, 1  ;;  %v255_v33 = vrot.slane %v189_v2, 1  ;;  %546 = vperm.xlu1 %1575, %v1853_v30  }
  0xed   :  { %v1069_v25 = vpop.permute.xlu0 %1068 }
  0xee   :  { %v2055_v11 = vpop.permute.xlu1 %274  ;;  %v1075_v24 = vmul.f32 %v1069_v25, %v1063_v51  ;;  %v1076_v19 = vmul.f32 %v1069_v25, %v1064_v38  ;;  %v2066_v49 = vsel %vm173_vm0, %v252_v27, %v253_v34  ;;  %v2071_v52 = vsel %vm173_vm0, %v255_v33, %v256_v58  ;;  %v1130_v33 = vld [vmem:[#allocation5 + $0x28] sm:$0xf] }
  0xf0   :  { %v2074_v37 = vmul.f32 %v1075_v24, %v2048_v6  ;;  %v2077_v5 = vmul.f32 %v1076_v19, %v2053_v60  ;;  %550 = vperm.xlu1 %1575, %v1798_v13  }
  0xf2   :  { %v1097_v4 = vpop.permute.xlu0 %1096 }
  0xf3   :  { %v2080_v53 = vpop.permute.xlu1 %287  ;;  %v2082_v50 = vmul.f32 %v1097_v4, %v1091_v61  ;;  %v2084_v51 = vmul.f32 %v1097_v4, %v1092_v18  ;;  %v206_v4 = vsub.f32 %v1885_v47, %v1976_v55 }
  0xf4   :  { %1576 = vset.pattern.permute.xlu1 %v1699_v10 }
  0xf5   :  { %1072 = vperm.xlu1 %1576, %v1986_v56  }
  0xf7   :  { %v2088_v38 = vpop.permute.xlu1 %291  ;;  %v197_v20 = vpop.permute.xlu0 %196 }
  0xf8   :  { %v204_v23 = vsub.f32 %v1885_v47, %v197_v20  ;;  %v205_v35 = vsub.f32 %v1887_v48, %v197_v20  ;;  %v207_v20 = vsub.f32 %v1887_v48, %v1976_v55 }
  0xf9   :  { %1579 = vset.pattern.permute.xlu1 %v1701_v12 }
  0xfa   :  { %v216_v13 = vmul.f32 %v1989_v57, %v204_v23  ;;  %v217_v61 = vmul.f32 %v1989_v57, %v205_v35  ;;  %1100 = vperm.xlu1 %1579, %v1986_v56   ;;  %v234_v35 = vsub.f32 %v2021_v28, %v1885_v47 }
  0xfb   :  { %v589_v18 = vpop.permute.xlu0 %588 }
  0xfc   :  { %v220_v63 = vmul.f32 %v216_v13, %v188_v32  ;;  %v221_v10 = vmul.f32 %v217_v61, %v189_v2  ;;  %v2096_v59 = vpop.permute.xlu1 %307  ;;  %v593_v32 = vsub.f32 %v1903_v1, %v589_v18  ;;  %v594_v2 = vsub.f32 %v1905_v3, %v589_v18 }
  0xfd   :  { %v246_v55 = vmul.f32 %v2035_v44, %v234_v35 }
  0xfe   :  { %1580 = vset.pattern.permute.xlu1 %v1702_v15 }
  0xff   :  { %583 = vperm.xlu1 %1580, %v1853_v30   ;;  %v1134_v36 = vpop.permute.xlu0 %1133 }
 0x100   :  { %v1141_v54 = vsub.f32 %v1881_v45, %v1134_v36  ;;  %v1142_v12 = vsub.f32 %v1883_v46, %v1134_v36 }
 0x101   :  { %v2102_v21 = vpop.permute.xlu1 %315 }
 0x103   :  { %1581 = vset.pattern.permute.xlu1 %v1704_v17 }
 0x104   :  { %612 = vperm.xlu1 %1581, %v1853_v30   ;;  %v1163_v56 = vpop.permute.xlu0 %1162 }
 0x105   :  { %v1169_v57 = vsub.f32 %v1163_v56, %v1881_v45  ;;  %v1170_v62 = vsub.f32 %v1163_v56, %v1883_v46 }
 0x106   :  { %v2108_v7 = vpop.permute.xlu1 %352 }
 0x108   :  { %616 = vperm.xlu1 %1581, %v1826_v22  }
 0x109   :  { %v214_v14 = vpop.permute.xlu0 %213 }
 0x10a   :  { %v2113_v27 = vpop.permute.xlu1 %357  ;;  %v218_v13 = vmul.f32 %v214_v14, %v206_v4  ;;  %v219_v61 = vmul.f32 %v214_v14, %v207_v20 }
 0x10b   :  { %2743 = vst [vmem:[#allocation11_spill] sm:$0xff] %v2113_v27 }
 0x10c   :  { %1582 = vset.pattern.permute.xlu1 %v1702_v15  ;;  %v235_v15 = vsub.f32 %v2021_v28, %v1887_v48  ;;  %v233_v28 = vsub.f32 %v2002_v8, %v1887_v48  ;;  %v223_v14 = vmul.f32 %v219_v61, %v2010_v41 }
 0x10d   :  { %1138 = vperm.xlu1 %1582, %v1130_v33   ;;  %v601_v25 = vpop.permute.xlu0 %600 }
 0x10e   :  { %v2116_v24 = vmul.f32 %v601_v25, %v593_v32  ;;  %v2118_v19 = vmul.f32 %v601_v25, %v594_v2  ;;  %v247_v32 = vmul.f32 %v2035_v44, %v235_v15  ;;  %v232_v25 = vsub.f32 %v2002_v8, %v1885_v47 }
 0x10f   :  { %v2124_v23 = vpop.permute.xlu1 %369 }
 0x110   :  { %2744 = vst [vmem:[#allocation12_spill] sm:$0xff] %v2124_v23  ;;  %v265_v44 = vmul.f32 %v256_v58, %v247_v32 }
 0x111   :  { %1585 = vset.pattern.permute.xlu1 %v1704_v17  ;;  %v1147_v18 = vpop.permute.xlu0 %1146  ;;  %v222_v17 = vmul.f32 %v218_v13, %v2008_v43 }
 0x112   :  { %1166 = vperm.xlu1 %1585, %v1130_v33   ;;  %v2131_v36 = vmul.f32 %v1147_v18, %v1141_v54  ;;  %v2133_v56 = vmul.f32 %v1147_v18, %v1142_v12  ;;  %v264_v12 = vmul.f32 %v253_v34, %v246_v55  ;;  %v2153_v8 = vadd.f32 %v265_v44, %v223_v14 }
 0x113   :  { %v2745_v55 = vmov 13  }
 0x114   :  { %v2137_v2 = vpop.permute.xlu1 %381  ;;  %v2151_v35 = vadd.f32 %v264_v12, %v222_v17 }
 0x116   :  { %1586 = vset.pattern.permute.xlu1 %v1703_v16  ;;  %v238_v54 = vpop.permute.xlu0 %237  ;;  %v2731_v32 = vrot.slane %v2151_v35, 1 }
 0x117   :  { %v244_v4 = vmul.f32 %v238_v54, %v232_v25  ;;  %v245_v20 = vmul.f32 %v238_v54, %v233_v28  ;;  %596 = vperm.xlu1 %1586, %v1853_v30   ;;  %v2730_v25 = vrot.slane %v2153_v8, 1 }
 0x119   :  { %v262_v15 = vmul.f32 %v2066_v49, %v244_v4  ;;  %v263_v13 = vmul.f32 %v2071_v52, %v245_v20  ;;  %v2157_v61 = vpop.permute.xlu1 %393 }
 0x11a   :  { %v1175_v18 = vpop.permute.xlu0 %1174 }
 0x11b   :  { %v266_v43 = vadd.f32 %v262_v15, %v220_v63  ;;  %v267_v34 = vadd.f32 %v263_v13, %v221_v10  ;;  %1587 = vset.pattern.permute.xlu1 %v2745_v55  ;;  %v2160_v41 = vmul.f32 %v1175_v18, %v1169_v57  ;;  %v2162_v58 = vmul.f32 %v1175_v18, %v1170_v62 }
 0x11c   :  { %624 = vperm.xlu1 %1587, %v1853_v30  }
 0x11d   :  { %v330_v49 = vrot.slane %v266_v43, 1  ;;  %v333_v28 = vrot.slane %v267_v34, 1 }
 0x11e   :  { %v446_v52 = vpop.permute.xlu1 %445 }
 0x11f   :  { %v280_v17 = vpop.permute.xlu0 %279  ;;  %v332_v63 = vsel %vm173_vm0, %v330_v49, %v2731_v32  ;;  %v335_v10 = vsel %vm173_vm0, %v333_v28, %v2730_v25  ;;  %v2748_v28 = vmov 14  }
 0x120   :  { %628 = vperm.xlu1 %1587, %v1826_v22   ;;  %v282_v22 = vsub.f32 %v1885_v47, %v2055_v11 }
 0x123   :  { %v471_v57 = vpop.permute.xlu1 %470  ;;  %v2174_v62 = vpop.permute.xlu0 %666 }
 0x124   :  { %2746 = vst [vmem:[#allocation13_spill] sm:$0xff] %v2174_v62  ;;  %1589 = vset.pattern.permute.xlu1 %v1703_v16  ;;  %v283_v16 = vsub.f32 %v1887_v48, %v2055_v11 }
 0x125   :  { %1150 = vperm.xlu1 %1589, %v1130_v33  }
 0x126   :  { %v295_v49 = vmul.f32 %v2080_v53, %v283_v16 }
 0x127   :  { %v2177_v14 = vpop.permute.xlu1 %474  ;;  %v2179_v54 = vpop.permute.xlu0 %1211 }
 0x128   :  { %2747 = vst [vmem:[#allocation14_spill] sm:$0xff] %v2179_v54  ;;  %v299_v13 = vmul.f32 %v295_v49, %v267_v34  ;;  %v2237_v49 = vld [vmem:[#allocation5 + $0x28] sm:$0x7] }
 0x129   :  { %1591 = vset.pattern.permute.xlu1 %v2745_v55 }
 0x12a   :  { %1178 = vperm.xlu1 %1591, %v1130_v33   ;;  %v294_v33 = vmul.f32 %v2080_v53, %v282_v22 }
 0x12c   :  { %v2190_v4 = vpop.permute.xlu1 %1000  ;;  %v304_v20 = vpop.permute.xlu0 %303  ;;  %v298_v29 = vmul.f32 %v294_v33, %v266_v43  ;;  %v478_v33 = vsub.f32 %v471_v57, %v1905_v3 }
 0x12d   :  { %v310_v18 = vsub.f32 %v304_v20, %v1885_v47  ;;  %v311_v55 = vsub.f32 %v304_v20, %v1887_v48  ;;  %v2749_v20 = vmov 16  }
 0x12e   :  { %1592 = vset.pattern.permute.xlu1 %v2748_v28 }
 0x12f   :  { %v322_v11 = vmul.f32 %v2102_v21, %v310_v18  ;;  %v323_v44 = vmul.f32 %v2102_v21, %v311_v55  ;;  %661 = vperm.xlu1 %1592, %v1853_v30   ;;  %v453_v18 = vsub.f32 %v1903_v1, %v446_v52  ;;  %v454_v55 = vsub.f32 %v1905_v3, %v446_v52 }
 0x130   :  { %v2204_v12 = vpop.permute.xlu0 %1240 }
 0x131   :  { %v340_v15 = vmul.f32 %v332_v63, %v322_v11  ;;  %v341_v25 = vmul.f32 %v335_v10, %v323_v44  ;;  %v2206_v32 = vpop.permute.xlu1 %1024  ;;  %v1247_v22 = vsub.f32 %v2204_v12, %v1881_v45  ;;  %v1248_v53 = vsub.f32 %v2204_v12, %v1883_v46 }
 0x132   :  { %v284_v63 = vsub.f32 %v1885_v47, %v280_v17  ;;  %v285_v10 = vsub.f32 %v1887_v48, %v280_v17  ;;  %v477_v17 = vsub.f32 %v471_v57, %v1903_v1  ;;  %v2750_v57 = vrot.slane %v2151_v35, 1 }
 0x133   :  { %1593 = vset.pattern.permute.xlu1 %v2749_v20  ;;  %v2217_v43 = vadd.f32 %v340_v15, %v298_v29  ;;  %v2219_v34 = vadd.f32 %v341_v25, %v299_v13  ;;  %v312_v15 = vsub.f32 %v2096_v59, %v1885_v47  ;;  %v313_v13 = vsub.f32 %v2096_v59, %v1887_v48 }
 0x134   :  { %690 = vperm.xlu1 %1593, %v1853_v30   ;;  %v296_v29 = vmul.f32 %v2088_v38, %v284_v63  ;;  %v297_v25 = vmul.f32 %v2088_v38, %v285_v10 }
 0x135   :  { %v2224_v44 = vpop.permute.xlu0 %674 }
 0x136   :  { %v459_v12 = vpop.permute.xlu1 %458  ;;  %v300_v10 = vmul.f32 %v296_v29, %v2151_v35  ;;  %v301_v59 = vmul.f32 %v297_v25, %v2153_v8 }
 0x137   :  { %v465_v11 = vmul.f32 %v459_v12, %v453_v18  ;;  %v466_v21 = vmul.f32 %v459_v12, %v454_v55  ;;  %v2751_v18 = vrot.slane %v2153_v8, 1 }
 0x138   :  { %694 = vperm.xlu1 %1593, %v1859_v31  }
 0x13a   :  { %v320_v16 = vpop.permute.xlu0 %319 }
 0x13b   :  { %v483_v52 = vpop.permute.xlu1 %482  ;;  %v324_v54 = vmul.f32 %v320_v16, %v312_v15  ;;  %v325_v63 = vmul.f32 %v320_v16, %v313_v13  ;;  %v479_v16 = vsub.f32 %v2177_v14, %v1903_v1 }
 0x13c   :  { %v489_v62 = vmul.f32 %v483_v52, %v477_v17  ;;  %v490_v38 = vmul.f32 %v483_v52, %v478_v33  ;;  %1595 = vset.pattern.permute.xlu1 %v2748_v28  ;;  %v480_v28 = vsub.f32 %v2177_v14, %v1905_v3  ;;  %v408_v14 = vrot.slane %v2217_v43, 1 }
 0x13d   :  { %1216 = vperm.xlu1 %1595, %v2237_v49   ;;  %v342_v23 = vmul.f32 %v2750_v57, %v324_v54  ;;  %v343_v12 = vmul.f32 %v2751_v18, %v325_v63 }
 0x13e   :  { %v493_v55 = vmin.f32 %v465_v11, %v489_v62  ;;  %v494_v27 = vmin.f32 %v466_v21, %v490_v38  ;;  %v2251_v29 = vpop.permute.xlu0 %706  ;;  %v411_v38 = vrot.slane %v2219_v34, 1 }
 0x13f   :  { %v487_v15 = vpop.permute.xlu1 %486  ;;  %v2253_v25 = vadd.f32 %v342_v23, %v300_v10  ;;  %v2255_v13 = vadd.f32 %v343_v12, %v301_v59  ;;  %v2754_v12 = vmov 21  }
 0x140   :  { %v491_v35 = vmul.f32 %v487_v15, %v479_v16  ;;  %v492_v54 = vmul.f32 %v487_v15, %v480_v28  ;;  %v2259_v62 = vmax.f32 %v493_v55, 0.0  ;;  %v2261_v21 = vmax.f32 %v494_v27, 0.0 }
 0x141   :  { %1596 = vset.pattern.permute.xlu1 %v2749_v20  ;;  %v2738_v8 = vrot.slane %v2253_v25, 1  ;;  %v2737_v11 = vrot.slane %v2255_v13, 1 }
 0x142   :  { %1244 = vperm.xlu1 %1596, %v2237_v49   ;;  %v495_v17 = vmin.f32 %v1917_v39, %v491_v35  ;;  %v496_v23 = vmin.f32 %v1919_v40, %v492_v54  ;;  %v1253_v33 = vpop.permute.xlu0 %1252  ;;  %v2752_v39 = vsub.f32 %v1881_v45, %v2190_v4  ;;  %v564_v18 = vrot.slane %v2261_v21, 1 }
 0x143   :  { %v2268_v63 = vmul.f32 %v1253_v33, %v1247_v22  ;;  %v2270_v20 = vmul.f32 %v1253_v33, %v1248_v53  ;;  %v410_v27 = vsel %vm173_vm0, %v408_v14, %v2738_v8  ;;  %v2753_v22 = vsub.f32 %v1883_v46, %v2190_v4 }
 0x144   :  { %v1013_v52 = vpop.permute.xlu1 %1012  ;;  %v2276_v10 = vmax.f32 %v495_v17, 0.0  ;;  %v2278_v59 = vmax.f32 %v496_v23, 0.0  ;;  %v561_v53 = vrot.slane %v2259_v62, 1  ;;  %v413_v55 = vsel %vm173_vm0, %v411_v38, %v2737_v11 }
 0x145   :  { %v1017_v40 = vmul.f32 %v1013_v52, %v2752_v39  ;;  %v1018_v57 = vmul.f32 %v1013_v52, %v2753_v22  ;;  %v2757_v33 = vmov 15   ;;  %v1111_v22 = vrot.slane %v2048_v6, 1 }
 0x146   :  { %1597 = vset.pattern.permute.xlu1 %v2754_v12  ;;  %v2294_v16 = vmul.f32 %v2038_v42, %v2276_v10  ;;  %v2298_v28 = vmul.f32 %v2040_v0, %v2278_v59  ;;  %v2742_v4 = vrot.slane %v2276_v10, 1  ;;  %v2741_v15 = vrot.slane %v2278_v59, 1 }
 0x147   :  { %397 = vperm.xlu1 %1597, %v1838_v26   ;;  %v2303_v35 = vpop.permute.xlu0 %739  ;;  %v2755_v0 = vsub.f32 %v2206_v32, %v1881_v45  ;;  %v2756_v26 = vsub.f32 %v2206_v32, %v1883_v46  ;;  %v2758_v8 = vmov 17  }
 0x148   :  { %v2308_v14 = vsel %vm173_vm0, %v561_v53, %v2742_v4  ;;  %v2313_v42 = vsel %vm173_vm0, %v564_v18, %v2741_v15  ;;  %v1114_v53 = vrot.slane %v2053_v60, 1 }
 0x149   :  { %v1037_v54 = vpop.permute.xlu1 %1036 }
 0x14a   :  { %v1041_v17 = vmul.f32 %v1037_v54, %v2755_v0  ;;  %v1042_v23 = vmul.f32 %v1037_v54, %v2756_v26 }
 0x14b   :  { %1600 = vset.pattern.permute.xlu1 %v2757_v33 }
 0x14c   :  { %v1045_v52 = vmin.f32 %v1017_v40, %v1041_v17  ;;  %v1046_v38 = vmin.f32 %v1018_v57, %v1042_v23  ;;  %678 = vperm.xlu1 %1600, %v1859_v31   ;;  %v2323_v39 = vpop.permute.xlu0 %385 }
 0x14e   :  { %v2327_v18 = vmax.f32 %v1045_v52, 0.0  ;;  %v2329_v11 = vmax.f32 %v1046_v38, 0.0  ;;  %v506_v0 = vpop.permute.xlu1 %505 }
 0x150   :  { %1601 = vset.pattern.permute.xlu1 %v2758_v8  ;;  %v2740_v32 = vrot.slane %v2327_v18, 1  ;;  %v2739_v40 = vrot.slane %v2329_v11, 1  ;;  %v2335_v31 = vpop.permute.xlu0 %772 }
 0x151   :  { %702 = vperm.xlu1 %1601, %v1853_v30  }
 0x152   :  { %v1113_v6 = vsel %vm173_vm0, %v1111_v22, %v2740_v32  ;;  %v1116_v60 = vsel %vm173_vm0, %v1114_v53, %v2739_v40  ;;  %v2358_v53 = vld [vmem:[#allocation5 + $0x20] sm:$0xff] }
 0x153   :  { %v535_v57 = vpop.permute.xlu1 %534  ;;  %v1121_v54 = vmul.f32 %v1113_v6, %v2082_v50  ;;  %v1122_v17 = vmul.f32 %v1116_v60, %v2084_v51  ;;  %v360_v6 = vsub.f32 %v1885_v47, %v2108_v7  ;;  %v361_v60 = vsub.f32 %v1887_v48, %v2108_v7 }
 0x154   :  { %v2346_v26 = vpop.permute.xlu0 %1318 }
 0x155   :  { %1602 = vset.pattern.permute.xlu1 %v2757_v33  ;;  %v2349_v23 = vadd.f32 %v1121_v54, %v2074_v37  ;;  %v2352_v52 = vadd.f32 %v1122_v17, %v2077_v5  ;;  %v388_v5 = vsub.f32 %v2137_v2, %v1885_v47  ;;  %v389_v33 = vsub.f32 %v2137_v2, %v1887_v48 }
 0x156   :  { %1224 = vperm.xlu1 %1602, %v2358_v53  }
 0x157   :  { %v539_v50 = vpop.permute.xlu1 %538  ;;  %v2363_v51 = vmul.f32 %v2131_v36, %v2349_v23  ;;  %v2367_v37 = vmul.f32 %v2133_v56, %v2352_v52  ;;  %v400_v54 = vmul.f32 %v2157_v61, %v388_v5  ;;  %v401_v36 = vmul.f32 %v2157_v61, %v389_v33 }
 0x159   :  { %v366_v17 = vpop.permute.xlu0 %365  ;;  %v418_v38 = vmul.f32 %v410_v27, %v400_v54  ;;  %v419_v32 = vmul.f32 %v413_v55, %v401_v36 }
 0x15a   :  { %1228 = vperm.xlu1 %1602, %v2237_v49   ;;  %v372_v56 = vmul.f32 %v366_v17, %v360_v6  ;;  %v373_v22 = vmul.f32 %v366_v17, %v361_v60  ;;  %v2760_v6 = vmov 20   ;;  %v542_v60 = vsub.f32 %v535_v57, %v1905_v3 }
 0x15c   :  { %v1061_v40 = vpop.permute.xlu1 %1060  ;;  %v376_v2 = vmul.f32 %v372_v56, %v2217_v43  ;;  %v377_v15 = vmul.f32 %v373_v22, %v2219_v34  ;;  %v2759_v43 = vmov 18   ;;  %v513_v34 = vsub.f32 %v1903_v1, %v506_v0 }
 0x15d   :  { %v1065_v4 = vsub.f32 %v1881_v45, %v1061_v40  ;;  %v1066_v7 = vsub.f32 %v1883_v46, %v1061_v40  ;;  %v514_v40 = vsub.f32 %v1905_v3, %v506_v0  ;;  %v543_v0 = vsub.f32 %v539_v50, %v1903_v1 }
 0x15e   :  { %1603 = vset.pattern.permute.xlu1 %v2758_v8  ;;  %v2385_v5 = vadd.f32 %v418_v38, %v376_v2  ;;  %v2388_v61 = vadd.f32 %v419_v32, %v377_v15  ;;  %v541_v32 = vsub.f32 %v535_v57, %v1903_v1  ;;  %v544_v56 = vsub.f32 %v539_v50, %v1905_v3 }
 0x15f   :  { %1256 = vperm.xlu1 %1603, %v2237_v49  }
 0x161   :  { %v1089_v33 = vpop.permute.xlu1 %1088 }
 0x162   :  { %v1093_v27 = vsub.f32 %v1089_v33, %v1881_v45  ;;  %v1094_v55 = vsub.f32 %v1089_v33, %v1883_v46 }
 0x163   :  { %1606 = vset.pattern.permute.xlu1 %v2759_v43 }
 0x164   :  { %744 = vperm.xlu1 %1606, %v1960_v9  }
 0x166   :  { %v519_v8 = vpop.permute.xlu1 %518 }
 0x167   :  { %v525_v38 = vmul.f32 %v519_v8, %v513_v34  ;;  %v526_v22 = vmul.f32 %v519_v8, %v514_v40 }
 0x168   :  { %1607 = vset.pattern.permute.xlu1 %v2760_v6 }
 0x169   :  { %v529_v49 = vmul.f32 %v525_v38, %v2259_v62  ;;  %v530_v15 = vmul.f32 %v526_v22, %v2261_v21  ;;  %768 = vperm.xlu1 %1607, %v1853_v30   ;;  %v1286_v21 = vld [vmem:[#allocation5 + $0x28] sm:$0x3]  ;;  %v2762_v38 = vrot.slane %v2278_v59, 1 }
 0x16b   :  { %v547_v54 = vpop.permute.xlu1 %546 }
 0x16c   :  { %v553_v36 = vmul.f32 %v547_v54, %v541_v32  ;;  %v554_v17 = vmul.f32 %v547_v54, %v542_v60 }
 0x16d   :  { %1608 = vset.pattern.permute.xlu1 %v2759_v43  ;;  %v2761_v43 = vrot.slane %v2276_v10, 1 }
 0x16e   :  { %v571_v2 = vmul.f32 %v2308_v14, %v553_v36  ;;  %v572_v62 = vmul.f32 %v2313_v42, %v554_v17  ;;  %1289 = vperm.xlu1 %1608, %v2358_v53  }
 0x16f   :  { %v551_v30 = vpop.permute.xlu1 %550 }
 0x170   :  { %v555_v33 = vmul.f32 %v551_v30, %v543_v0  ;;  %v556_v34 = vmul.f32 %v551_v30, %v544_v56  ;;  %v2408_v57 = vadd.f32 %v571_v2, %v529_v49  ;;  %v2410_v40 = vadd.f32 %v572_v62, %v530_v15 }
 0x171   :  { %v2763_v0 = vmov 19   ;;  %v2765_v2 = vrot.slane %v2329_v11, 1 }
 0x172   :  { %v573_v8 = vmul.f32 %v2761_v43, %v555_v33  ;;  %v574_v50 = vmul.f32 %v2762_v38, %v556_v34  ;;  %1294 = vperm.xlu1 %1608, %v1286_v21   ;;  %v639_v49 = vrot.slane %v2408_v57, 1  ;;  %v642_v15 = vrot.slane %v2410_v40, 1 }
 0x173   :  { %v1189_v43 = vrot.slane %v2349_v23, 1 }
 0x174   :  { %v2417_v14 = vadd.f32 %v573_v8, %v2294_v16  ;;  %v2420_v42 = vadd.f32 %v574_v50, %v2298_v28  ;;  %v1073_v22 = vpop.permute.xlu1 %1072  ;;  %v1617_v8 = vld [vmem:[#allocation5 + $0x10] sm:$0xff] }
 0x175   :  { %v1077_v32 = vmul.f32 %v1073_v22, %v1065_v4  ;;  %v1078_v60 = vmul.f32 %v1073_v22, %v1066_v7 }
 0x176   :  { %v640_v10 = vrot.slane %v2417_v14, 1  ;;  %v643_v54 = vrot.slane %v2420_v42, 1  ;;  %1610 = vset.pattern.permute.xlu1 %v2760_v6  ;;  %v2429_v59 = vmul.f32 %v2116_v24, %v2417_v14  ;;  %v2433_v16 = vmul.f32 %v2118_v19, %v2420_v42 }
 0x177   :  { %v1081_v28 = vmul.f32 %v1077_v32, %v2327_v18  ;;  %v1082_v4 = vmul.f32 %v1078_v60, %v2329_v11  ;;  %1322 = vperm.xlu1 %1610, %v1286_v21   ;;  %v2764_v19 = vrot.slane %v2327_v18, 1  ;;  %v1192_v18 = vrot.slane %v2352_v52, 1 }
 0x178   :  { %v641_v7 = vsel %vm173_vm0, %v639_v49, %v640_v10  ;;  %v644_v6 = vsel %vm173_vm0, %v642_v15, %v643_v54 }
 0x179   :  { %v1101_v36 = vpop.permute.xlu1 %1100 }
 0x17a   :  { %v1105_v24 = vmul.f32 %v1101_v36, %v1093_v27  ;;  %v1106_v17 = vmul.f32 %v1101_v36, %v1094_v55 }
 0x17b   :  { %1611 = vset.pattern.permute.xlu1 %v2763_v0 }
 0x17c   :  { %v1123_v56 = vmul.f32 %v2764_v19, %v1105_v24  ;;  %v1124_v62 = vmul.f32 %v2765_v2, %v1106_v17  ;;  %756 = vperm.xlu1 %1611, %v1960_v9  }
 0x17e   :  { %v584_v30 = vpop.permute.xlu1 %583  ;;  %v2449_v33 = vadd.f32 %v1123_v56, %v1081_v28  ;;  %v2451_v34 = vadd.f32 %v1124_v62, %v1082_v4  ;;  %v1714_v4 = vmov 0.0  }
 0x17f   :  { %v592_v28 = vsub.f32 %v1905_v3, %v584_v30  ;;  %970 = vmatprep.mubr.f32.mxu0 %v1714_v4  ;;  %890 = vmatprep.mubr.f32.mxu1 %v1714_v4 }
 0x180   :  { %1612 = vset.pattern.permute.xlu1 %v2754_v12  ;;  %v1190_v27 = vrot.slane %v2449_v33, 1  ;;  %v1193_v55 = vrot.slane %v2451_v34, 1 }
 0x181   :  { %780 = vperm.xlu1 %1612, %v1617_v8  }
 0x182   :  { %v1191_v9 = vsel %vm173_vm0, %v1189_v43, %v1190_v27  ;;  %v1194_v11 = vsel %vm173_vm0, %v1192_v18, %v1193_v55 }
 0x183   :  { %v613_v38 = vpop.permute.xlu1 %612  ;;  %v1199_v50 = vmul.f32 %v1191_v9, %v2160_v41  ;;  %v1200_v22 = vmul.f32 %v1194_v11, %v2162_v58 }
 0x184   :  { %v619_v17 = vsub.f32 %v613_v38, %v1903_v1 }
 0x185   :  { %1614 = vset.pattern.permute.xlu1 %v2763_v0  ;;  %v2468_v23 = vadd.f32 %v1199_v50, %v2363_v51  ;;  %v2471_v52 = vadd.f32 %v1200_v22, %v2367_v37  ;;  %v591_v37 = vsub.f32 %v1903_v1, %v584_v30  ;;  %v620_v0 = vsub.f32 %v613_v38, %v1905_v3 }
 0x186   :  { %1302 = vperm.xlu1 %1614, %v2358_v53  }
 0x187   :  { %v617_v32 = vpop.permute.xlu1 %616 }
 0x188   :  { %v621_v62 = vsub.f32 %v617_v32, %v1903_v1  ;;  %v622_v30 = vsub.f32 %v617_v32, %v1905_v3 }
 0x18a   :  { %1306 = vperm.xlu1 %1614, %v1286_v21  }
 0x18c   :  { %v1139_v60 = vpop.permute.xlu1 %1138 }
 0x18d   :  { %v1143_v49 = vsub.f32 %v1881_v45, %v1139_v60  ;;  %v1144_v15 = vsub.f32 %v1883_v46, %v1139_v60 }
 0x18e   :  { %1615 = vset.pattern.permute.xlu1 %v2754_v12 }
 0x18f   :  { %1334 = vperm.xlu1 %1615, %v1286_v21  }
 0x191   :  { %v1167_v41 = vpop.permute.xlu1 %1166 }
 0x192   :  { %v1171_v58 = vsub.f32 %v1167_v41, %v1881_v45  ;;  %v1172_v51 = vsub.f32 %v1167_v41, %v1883_v46 }
 0x196   :  { %v597_v53 = vpop.permute.xlu1 %596 }
 0x197   :  { %v603_v36 = vmul.f32 %v597_v53, %v591_v37  ;;  %v604_v24 = vmul.f32 %v597_v53, %v592_v28 }
 0x199   :  { %v607_v12 = vmul.f32 %v603_v36, %v2408_v57  ;;  %v608_v21 = vmul.f32 %v604_v24, %v2410_v40 }
 0x19b   :  { %v625_v19 = vpop.permute.xlu1 %624 }
 0x19c   :  { %v631_v56 = vmul.f32 %v625_v19, %v619_v17  ;;  %v632_v2 = vmul.f32 %v625_v19, %v620_v0 }
 0x19e   :  { %v649_v43 = vmul.f32 %v641_v7, %v631_v56  ;;  %v650_v18 = vmul.f32 %v644_v6, %v632_v2 }
 0x19f   :  { %v629_v8 = vpop.permute.xlu1 %628 }
 0x1a0   :  { %v653_v9 = vadd.f32 %v649_v43, %v607_v12  ;;  %v654_v11 = vadd.f32 %v650_v18, %v608_v21  ;;  %v633_v50 = vmul.f32 %v629_v8, %v621_v62  ;;  %v634_v57 = vmul.f32 %v629_v8, %v622_v30 }
 0x1a2   :  { %v651_v40 = vmul.f32 %v640_v10, %v633_v50  ;;  %v652_v38 = vmul.f32 %v643_v54, %v634_v57  ;;  %v717_v41 = vrot.slane %v653_v9, 1  ;;  %v720_v37 = vrot.slane %v654_v11, 1 }
 0x1a4   :  { %v2494_v22 = vadd.f32 %v651_v40, %v2429_v59  ;;  %v2497_v60 = vadd.f32 %v652_v38, %v2433_v16  ;;  %v1151_v32 = vpop.permute.xlu1 %1150  ;;  %v391_v40 = vsub.f32 %v2323_v39, %v1887_v48  ;;  %v2766_v38 = vld [vmem:[#allocation11_spill] sm:$0xff] }
 0x1a5   :  { %v1155_v7 = vmul.f32 %v1151_v32, %v1143_v49  ;;  %v1156_v6 = vmul.f32 %v1151_v32, %v1144_v15  ;;  %v362_v32 = vsub.f32 %v1885_v47, %v2766_v38 }
 0x1a6   :  { %v718_v28 = vrot.slane %v2494_v22, 1  ;;  %v721_v53 = vrot.slane %v2497_v60, 1 }
 0x1a7   :  { %v1159_v14 = vmul.f32 %v1155_v7, %v2449_v33  ;;  %v1160_v42 = vmul.f32 %v1156_v6, %v2451_v34  ;;  %v1270_v33 = vrot.slane %v2471_v52, 1  ;;  %v363_v7 = vsub.f32 %v1887_v48, %v2766_v38  ;;  %v2767_v6 = vld [vmem:[#allocation12_spill] sm:$0xff] }
 0x1a8   :  { %v2506_v10 = vsel %vm173_vm0, %v717_v41, %v718_v28  ;;  %v2511_v54 = vsel %vm173_vm0, %v720_v37, %v721_v53  ;;  %v374_v41 = vmul.f32 %v2767_v6, %v362_v32  ;;  %v2769_v48 = vrot.slane %v2255_v13, 1 }
 0x1a9   :  { %v1179_v59 = vpop.permute.xlu1 %1178  ;;  %v375_v37 = vmul.f32 %v2767_v6, %v363_v7 }
 0x1aa   :  { %v1183_v16 = vmul.f32 %v1179_v59, %v1171_v58  ;;  %v1184_v49 = vmul.f32 %v1179_v59, %v1172_v51  ;;  %v1267_v51 = vrot.slane %v2468_v23, 1 }
 0x1ac   :  { %v1201_v15 = vmul.f32 %v1190_v27, %v1183_v16  ;;  %v1202_v36 = vmul.f32 %v1193_v55, %v1184_v49  ;;  %v753_v16 = vpop.permute.xlu0 %752 }
 0x1ae   :  { %v2517_v24 = vadd.f32 %v1201_v15, %v1159_v14  ;;  %v2519_v12 = vadd.f32 %v1202_v36, %v1160_v42  ;;  %v662_v21 = vpop.permute.xlu1 %661  ;;  %v379_v36 = vmul.f32 %v375_v37, %v2255_v13  ;;  %v778_v13 = vsub.f32 %v2335_v31, %v1905_v3 }
 0x1af   :  { %v669_v17 = vsub.f32 %v1903_v1, %v662_v21  ;;  %v670_v0 = vsub.f32 %v1905_v3, %v662_v21 }
 0x1b0   :  { %v1268_v19 = vrot.slane %v2517_v24, 1  ;;  %v1271_v58 = vrot.slane %v2519_v12, 1  ;;  %v785_v32 = vpop.permute.xlu0 %784 }
 0x1b1   :  { %v681_v34 = vmul.f32 %v2224_v44, %v669_v17  ;;  %v682_v27 = vmul.f32 %v2224_v44, %v670_v0  ;;  %v2770_v0 = vld [vmem:[#allocation13_spill] sm:$0xff] }
 0x1b2   :  { %v1269_v55 = vsel %vm173_vm0, %v1267_v51, %v1268_v19  ;;  %v1272_v56 = vsel %vm173_vm0, %v1270_v33, %v1271_v58  ;;  %v671_v51 = vsub.f32 %v1903_v1, %v2770_v0  ;;  %v672_v33 = vsub.f32 %v1905_v3, %v2770_v0 }
 0x1b3   :  { %v2535_v2 = vmul.f32 %v681_v34, %v653_v9  ;;  %v2537_v62 = vmul.f32 %v682_v27, %v654_v11  ;;  %v691_v30 = vpop.permute.xlu1 %690  ;;  %v2540_v43 = vmul.f32 %v1269_v55, %v2268_v63  ;;  %v2543_v18 = vmul.f32 %v1272_v56, %v2270_v20 }
 0x1b4   :  { %v390_v20 = vsub.f32 %v2323_v39, %v1885_v47  ;;  %v378_v39 = vmul.f32 %v374_v41, %v2253_v25  ;;  %v2768_v47 = vrot.slane %v2253_v25, 1  ;;  %v777_v55 = vsub.f32 %v2335_v31, %v1903_v1 }
 0x1b7   :  { %v695_v44 = vpop.permute.xlu1 %694 }
 0x1b8   :  { %v699_v14 = vsub.f32 %v695_v44, %v1903_v1  ;;  %v700_v42 = vsub.f32 %v695_v44, %v1905_v3 }
 0x1ba   :  { %v711_v34 = vmul.f32 %v2251_v29, %v699_v14  ;;  %v712_v27 = vmul.f32 %v2251_v29, %v700_v42  ;;  %v747_v29 = vsub.f32 %v1903_v1, %v2303_v35  ;;  %v748_v42 = vsub.f32 %v1905_v3, %v2303_v35  ;;  %v426_v35 = vld [vmem:[%s2710_s2] sm:$0x3] }
 0x1bc   :  { %v2545_v8 = vpop.permute.xlu1 %1216  ;;  %v729_v41 = vmul.f32 %v718_v28, %v711_v34  ;;  %v730_v31 = vmul.f32 %v721_v53, %v712_v27  ;;  %v2773_v27 = vld [vmem:[#allocation14_spill] sm:$0xff] }
 0x1bd   :  { %v1221_v50 = vsub.f32 %v1881_v45, %v2545_v8  ;;  %v1222_v57 = vsub.f32 %v1883_v46, %v2545_v8 }
 0x1c1   :  { %v2551_v9 = vpop.permute.xlu1 %1244 }
 0x1c2   :  { %v1249_v11 = vsub.f32 %v2551_v9, %v1881_v45  ;;  %v1250_v63 = vsub.f32 %v2551_v9, %v1883_v46  ;;  %v2777_v9 = vsub.f32 %v2346_v26, %v1883_v46 }
 0x1c6   :  { %v398_v59 = vpop.permute.xlu1 %397 }
 0x1c7   :  { %v402_v49 = vmul.f32 %v398_v59, %v390_v20  ;;  %v403_v15 = vmul.f32 %v398_v59, %v391_v40  ;;  %v697_v59 = vsub.f32 %v691_v30, %v1903_v1 }
 0x1c9   :  { %v420_v21 = vmul.f32 %v2768_v47, %v402_v49  ;;  %v421_v17 = vmul.f32 %v2769_v48, %v403_v15  ;;  %v698_v49 = vsub.f32 %v691_v30, %v1905_v3  ;;  %v760_v47 = vmul.f32 %v753_v16, %v748_v42 }
 0x1ca   :  { %v2776_v42 = vsub.f32 %v2346_v26, %v1881_v45 }
 0x1cb   :  { %v424_v56 = vadd.f32 %v420_v21, %v378_v39  ;;  %v679_v25 = vpop.permute.xlu1 %678  ;;  %v425_v44 = vadd.f32 %v421_v17, %v379_v36  ;;  %v759_v36 = vmul.f32 %v753_v16, %v747_v29 }
 0x1cc   :  { %v683_v20 = vmul.f32 %v679_v25, %v671_v51  ;;  %v684_v40 = vmul.f32 %v679_v25, %v672_v33 }
 0x1cd   :  { %v1493_v7 = vpack.c.bf16 %v425_v44, %v2388_v61  ;;  %v1496_v6 = vpack.c.bf16 %v424_v56, %v2385_v5  ;;  %v789_v5 = vmul.f32 %v785_v32, %v777_v55  ;;  %v2774_v55 = vsub.f32 %v1881_v45, %v2773_v27 }
 0x1ce   :  { %v687_v37 = vmul.f32 %v683_v20, %v2494_v22  ;;  %v688_v14 = vmul.f32 %v684_v40, %v2497_v60  ;;  %v790_v22 = vmul.f32 %v785_v32, %v778_v13 }
 0x1cf   :  { %1495 = vmatprep.subr.msk.bf16.mxu0 %vm2585_vm3, %v1493_v7 }
 0x1d0   :  { %v2605_v61 = vadd.f32 %v729_v41, %v687_v37  ;;  %v2607_v28 = vadd.f32 %v730_v31, %v688_v14  ;;  %v703_v53 = vpop.permute.xlu1 %702  ;;  %1498 = vmatpush1.bf16.msk.msra.mxu0 %vm2585_vm3, %v1496_v6 }
 0x1d1   :  { %v709_v60 = vmul.f32 %v703_v53, %v697_v59  ;;  %v710_v30 = vmul.f32 %v703_v53, %v698_v49 }
 0x1d2   :  { %v796_v15 = vrot.slane %v2605_v61, 1  ;;  %v799_v39 = vrot.slane %v2607_v28, 1 }
 0x1d3   :  { %v727_v21 = vmul.f32 %v2506_v10, %v709_v60  ;;  %v728_v48 = vmul.f32 %v2511_v54, %v710_v30  ;;  %1481 = vmatmul.mubr.msk.f32.vlgmr.msra.gmra.mrb[0].mxu0 %vm815_vm4, %v426_v35  ;;  %v2775_v10 = vsub.f32 %v1883_v46, %v2773_v27 }
 0x1d4   :  { %v807_v17 = vmul.f32 %v796_v15, %v789_v5  ;;  %v808_v0 = vmul.f32 %v799_v39, %v790_v22  ;;  %1438 = vmatprep.mubr.f32.mxu0 %v1714_v4 }
 0x1d5   :  { %v731_v51 = vadd.f32 %v727_v21, %v2535_v2  ;;  %v732_v33 = vadd.f32 %v728_v48, %v2537_v62  ;;  %v1225_v34 = vpop.permute.xlu1 %1224 }
 0x1d6   :  { %v1231_v56 = vmul.f32 %v1225_v34, %v2774_v55  ;;  %v1232_v16 = vmul.f32 %v1225_v34, %v2775_v10 }
 0x1d7   :  { %v795_v54 = vrot.slane %v731_v51, 1  ;;  %v798_v25 = vrot.slane %v732_v33, 1  ;;  %v763_v44 = vmul.f32 %v759_v36, %v731_v51  ;;  %v764_v13 = vmul.f32 %v760_v47, %v732_v33 }
 0x1d8   :  { %v1235_v20 = vmul.f32 %v1231_v56, %v2468_v23  ;;  %v1236_v4 = vmul.f32 %v1232_v16, %v2471_v52 }
 0x1d9   :  { %v1229_v2 = vpop.permute.xlu1 %1228  ;;  %v797_v62 = vsel %vm173_vm0, %v795_v54, %v796_v15  ;;  %v800_v40 = vsel %vm173_vm0, %v798_v25, %v799_v39 }
 0x1da   :  { %v1281_v32 = vadd.f32 %v2540_v43, %v1235_v20  ;;  %v1282_v29 = vadd.f32 %v2543_v18, %v1236_v4  ;;  %v1233_v7 = vmul.f32 %v1229_v2, %v1221_v50  ;;  %v1234_v6 = vmul.f32 %v1229_v2, %v1222_v57  ;;  %v1331_v50 = vpop.permute.xlu0 %1330 }
 0x1dc   :  { %v1237_v23 = vmul.f32 %v1233_v7, %v2517_v24  ;;  %v1238_v52 = vmul.f32 %v1234_v6, %v2519_v12  ;;  %v1345_v59 = vrot.slane %v1281_v32, 1  ;;  %v1348_v24 = vrot.slane %v1282_v29, 1 }
 0x1de   :  { %v1257_v41 = vpop.permute.xlu1 %1256 }
 0x1df   :  { %v1261_v31 = vmul.f32 %v1257_v41, %v1249_v11  ;;  %v1262_v43 = vmul.f32 %v1257_v41, %v1250_v63  ;;  %v1337_v11 = vmul.f32 %v1331_v50, %v2776_v42  ;;  %v1338_v63 = vmul.f32 %v1331_v50, %v2777_v9 }
 0x1e1   :  { %v1279_v18 = vmul.f32 %v1268_v19, %v1261_v31  ;;  %v1280_v8 = vmul.f32 %v1271_v58, %v1262_v43 }
 0x1e3   :  { %v2652_v57 = vadd.f32 %v1279_v18, %v1237_v23  ;;  %v2654_v37 = vadd.f32 %v1280_v8, %v1238_v52  ;;  %v745_v14 = vpop.permute.xlu1 %744 }
 0x1e4   :  { %v749_v15 = vsub.f32 %v1903_v1, %v745_v14  ;;  %v750_v26 = vsub.f32 %v1905_v3, %v745_v14 }
 0x1e5   :  { %v1346_v19 = vrot.slane %v2652_v57, 1  ;;  %v1349_v12 = vrot.slane %v2654_v37, 1 }
 0x1e7   :  { %v1347_v58 = vsel %vm173_vm0, %v1345_v59, %v1346_v19  ;;  %v1350_v49 = vsel %vm173_vm0, %v1348_v24, %v1349_v12 }
 0x1e8   :  { %v1355_v5 = vmul.f32 %v1347_v58, %v1337_v11  ;;  %v1356_v53 = vmul.f32 %v1350_v49, %v1338_v63  ;;  %v769_v22 = vpop.permute.xlu1 %768 }
 0x1e9   :  { %v775_v51 = vsub.f32 %v769_v22, %v1903_v1  ;;  %v776_v33 = vsub.f32 %v769_v22, %v1905_v3 }
 0x1ed   :  { %v1290_v35 = vpop.permute.xlu1 %1289 }
 0x1ee   :  { %v1297_v25 = vsub.f32 %v1881_v45, %v1290_v35  ;;  %v1298_v20 = vsub.f32 %v1883_v46, %v1290_v35 }
 0x1f1   :  { %v1295_v60 = vpop.permute.xlu1 %1294 }
 0x1f2   :  { %v1299_v3 = vsub.f32 %v1881_v45, %v1295_v60 }
 0x1f6   :  { %v1323_v30 = vpop.permute.xlu1 %1322 }
 0x1f7   :  { %v1328_v43 = vsub.f32 %v1323_v30, %v1883_v46 }
 0x1fb   :  { %v757_v39 = vpop.permute.xlu1 %756 }
 0x1fc   :  { %v761_v36 = vmul.f32 %v757_v39, %v749_v15  ;;  %v762_v47 = vmul.f32 %v757_v39, %v750_v26 }
 0x1fe   :  { %v765_v21 = vmul.f32 %v761_v36, %v2605_v61  ;;  %v766_v48 = vmul.f32 %v762_v47, %v2607_v28 }
 0x200   :  { %v811_v34 = vadd.f32 %v807_v17, %v765_v21  ;;  %v781_v27 = vpop.permute.xlu1 %780  ;;  %v812_v55 = vadd.f32 %v808_v0, %v766_v48  ;;  %v1300_v17 = vsub.f32 %v1883_v46, %v1295_v60 }
 0x201   :  { %v787_v56 = vmul.f32 %v781_v27, %v775_v51  ;;  %v788_v10 = vmul.f32 %v781_v27, %v776_v33 }
 0x203   :  { %v805_v16 = vmul.f32 %v797_v62, %v787_v56  ;;  %v806_v54 = vmul.f32 %v800_v40, %v788_v10 }
 0x205   :  { %v809_v4 = vadd.f32 %v805_v16, %v763_v44  ;;  %v1303_v2 = vpop.permute.xlu1 %1302  ;;  %v810_v61 = vadd.f32 %v806_v54, %v764_v13  ;;  %v1475_v13 = vld [vmem:[%s2710_s2 + $0x2] sm:$0x3] }
 0x206   :  { %v1309_v7 = vmul.f32 %v1303_v2, %v1297_v25  ;;  %v1310_v28 = vmul.f32 %v1303_v2, %v1298_v20 }
 0x207   :  { %v1487_v6 = vpack.c.bf16 %v812_v55, %v810_v61  ;;  %v1490_v1 = vpack.c.bf16 %v811_v34, %v809_v4 }
 0x208   :  { %v1313_v0 = vmul.f32 %v1309_v7, %v1281_v32  ;;  %v1314_v23 = vmul.f32 %v1310_v28, %v1282_v29  ;;  %v1327_v29 = vsub.f32 %v1323_v30, %v1881_v45  ;;  %v1482_v45 = vld [vmem:[%s2710_s2 + $0x4] sm:$0x3] }
 0x209   :  { %v1307_v52 = vpop.permute.xlu1 %1306  ;;  %1489 = vmatprep.subr.msk.bf16.mxu1 %vm2585_vm3, %v1487_v6 }
 0x20a   :  { %v1359_v62 = vadd.f32 %v1355_v5, %v1313_v0  ;;  %v1360_v40 = vadd.f32 %v1356_v53, %v1314_v23  ;;  %v1311_v41 = vmul.f32 %v1307_v52, %v1299_v3  ;;  %v1312_v44 = vmul.f32 %v1307_v52, %v1300_v17  ;;  %1492 = vmatpush1.bf16.msk.msra.mxu1 %vm2585_vm3, %v1490_v1 }
 0x20c   :  { %v1315_v31 = vmul.f32 %v1311_v41, %v2652_v57  ;;  %v1316_v32 = vmul.f32 %v1312_v44, %v2654_v37 }
 0x20d   :  { %1478 = vmatmul.mubr.msk.f32.vlgmr.msra.gmra.mrb[0].mxu1 %vm815_vm4, %v1475_v13 }
 0x20e   :  { %v1335_v18 = vpop.permute.xlu1 %1334 }
 0x20f   :  { %v1339_v8 = vmul.f32 %v1335_v18, %v1327_v29  ;;  %v1340_v50 = vmul.f32 %v1335_v18, %v1328_v43 }
 0x211   :  { %v1357_v14 = vmul.f32 %v1346_v19, %v1339_v8  ;;  %v1358_v42 = vmul.f32 %v1349_v12, %v1340_v50 }
 0x213   :  { %v1361_v11 = vadd.f32 %v1357_v14, %v1315_v31  ;;  %v1362_v9 = vadd.f32 %v1358_v42, %v1316_v32 }
 0x215   :  { %v1499_v63 = vpack.c.bf16 %v1362_v9, %v1360_v40  ;;  %v1502_v59 = vpack.c.bf16 %v1361_v11, %v1359_v62 }
 0x217   :  { %1501 = vmatprep.subr.msk.bf16.mxu0 %vm2585_vm3, %v1499_v63 }
 0x218   :  { %1504 = vmatpush1.bf16.msk.msra.mxu0 %vm2585_vm3, %v1502_v59 }
 0x21b   :  { %1485 = vmatmul.mubr.msk.f32.vlgmr.msra.gmra.mrb[0].mxu0 %vm815_vm4, %v1482_v45 }
 0x2e0   :  { %v892_v46 = vpop.f32.mrb[0].mxu1 }
 0x2e1   :  { %v894_v57 = vpop.f32.mrb[1].mxu1 }
 0x2ee   :  { %v1440_v37 = vpop.f32.mrb[0].mxu0 }
 0x2ef   :  { %v1505_v24 = vadd.f32 %v1440_v37, %v892_v46  ;;  %v1442_v19 = vpop.f32.mrb[1].mxu0 }
 0x2f0   :  { %v1506_v12 = vadd.f32 %v1442_v19, %v894_v57 }
 0x2f2   :  { %v1449_v58 = vcombine.low %v1505_v24, %v1506_v12 }
 0x2f4   :  { %1486 = vst.sshfl [vmem:[#allocation7] sm:$0x33 pattern:$0x76325410] %v1449_v58 }
 0x2f5   :  { %1673 = shalt.err (!%p1670_p6)
}
 0x2f6   :  { %s1674_s19 = scalar_lea.hbm %s2711_s3, 64 }
 0x2f7   :  { %p1675_p7 = scmp.ne.s32.totalorder %s2711_s3, %s1674_s19  ;;  %p1678_p8 = scmp.lt.u32.totalorder %s1674_s19, %s2711_s3 }
 0x2f9   :  { %p1680_p9 = pnand %p1678_p8, %p1675_p7 }
 0x2fb   :  { %1683 = shalt.err (!%p1680_p9)
}
 0x2fc   :  { %1468 = dma.vmem_to_hbm [thread:$0]  %s1466_s16, 64, %s2711_s3, [#allocation4]  }
 0x2fd   :  { %1688 = dma.done.wait [#allocation4], 64  }
 0x2fe   :  { %1689 = vsyncadd [#allocation4], 4294967232 }
 0x2ff   :  { %1472 = vsyncpa [#allocation3], 1 }
 0x300   :  { %1473 = vsyncpa [#allocation6], 1 }
 0x301   :  { %1474 = vsyncpa [#allocation4], 1 }

</bundles_post_ra>
